<compile_context>
chip_gen: v5e
topology: v5e:2x2
jax: 0.10.0
libtpu: 0.0.40
codegen_flags: <defaults>
</compile_context>

<pallas_src>
import functools
import math

import jax
import jax.numpy as jnp
from jax.experimental import pallas as pl
from jax.experimental.pallas import tpu as pltpu

SILU_SCALE = 1.0 / 0.6  # ScaledSiLU scale factor used in OCP's PaiNN


def _round_up(v, m):
    return ((v + m - 1) // m) * m


def painn_update_kernel(
    x_ref, vec_ref,
    wv_ref, w1a_ref, w1b_ref, b1_ref, w2_ref, b2_ref,
    dx_ref, dvec_ref,
    vec1_scr,
    *, hidden, approx_recip,
):
    H = hidden
    TN = x_ref.shape[0]
    inv_sqrt_h = 1.0 / math.sqrt(H)
    inv_sqrt_2 = 1.0 / math.sqrt(2.0)

    wv = wv_ref[...]                                    # (H, 2H) fused vec_proj

    # vec_proj per spatial component (lane slices of the flat (TN, 3H) block);
    # the dim=1 (spatial) reductions become cheap running elementwise adds.
    vec_dot = jnp.zeros((TN, H), jnp.float32)
    vec2_sq = jnp.zeros((TN, H), jnp.float32)
    for d in range(3):
        vd = vec_ref[:, d * H:(d + 1) * H]              # (TN, H)
        pd = jnp.dot(vd, wv, preferred_element_type=jnp.float32)   # (TN, 2H)
        v1d = pd[:, :H]
        v2d = pd[:, H:]
        vec1_scr[:, d * H:(d + 1) * H] = v1d            # lane-dense VMEM stash
        vec_dot = vec_dot + v1d * v2d
        vec2_sq = vec2_sq + v2d * v2d
    vec_dot = vec_dot * inv_sqrt_h
    vec_norm = jnp.sqrt(vec2_sq + 1e-8)                 # ||vec2|| over spatial axis

    # xvec_proj[0] on cat([x, vec_norm], -1): two matmuls into one accumulator
    # (exactly equivalent to concatenation followed by one matmul).
    h = (
        jnp.dot(x_ref[...], w1a_ref[...], preferred_element_type=jnp.float32)
        + jnp.dot(vec_norm.astype(w1b_ref.dtype), w1b_ref[...],
                  preferred_element_type=jnp.float32)
        + b1_ref[...]
    )
    # ScaledSiLU via the EUP path: exp + reciprocal (approx only for bf16).
    sig = pl.reciprocal(1.0 + jnp.exp(-h), approx=approx_recip)
    h = h * sig * SILU_SCALE

    # xvec_proj[2]: single fused (H, 3H) matmul, sliced in-register.
    out = jnp.dot(h.astype(w2_ref.dtype), w2_ref[...],
                  preferred_element_type=jnp.float32) + b2_ref[...]
    xvec1 = out[:, :H]
    xvec2 = out[:, H:2 * H]
    xvec3 = out[:, 2 * H:]

    dx_ref[...] = ((xvec1 + xvec2 * vec_dot) * inv_sqrt_2).astype(dx_ref.dtype)
    # dvec: one full-width lane slab per spatial component (flat layout).
    for d in range(3):
        dvec_ref[:, d * H:(d + 1) * H] = (
            xvec3 * vec1_scr[:, d * H:(d + 1) * H]
        ).astype(dvec_ref.dtype)


def painn_update(x, vec, params, *, tile_n=256):
    """x: (N, H), vec: (N, 3, H)  ->  dx: (N, H), dvec: (N, 3, H)."""
    N, H = x.shape
    assert vec.shape == (N, 3, H)

    vec_flat = vec.reshape(N, 3 * H)                    # free row-major view

    # Sublane-aligned row tile; ensure >=2 grid steps whenever N allows it so
    # the single "parallel" axis shards across both v7x TensorCores.
    itemsize = jnp.dtype(x.dtype).itemsize
    align = 16 if itemsize < 4 else 8
    tile_n = max(align, min(_round_up(tile_n, align),
                            _round_up(pl.cdiv(N, 2), align)))
    grid = (pl.cdiv(N, tile_n),)                        # ragged tail masked by Pallas

    approx_recip = bool(jnp.dtype(x.dtype) == jnp.bfloat16)
    kernel = functools.partial(painn_update_kernel, hidden=H,
                               approx_recip=approx_recip)

    row_spec = pl.BlockSpec((tile_n, H), lambda i: (i, 0))
    vec_spec = pl.BlockSpec((tile_n, 3 * H), lambda i: (i, 0))
    weight_shapes = [(H, 2 * H), (H, H), (H, H), (1, H), (H, 3 * H), (1, 3 * H)]

    # VMEM budget (flat layout): double-buffered row IO + weights + f32 vec1
    # scratch + in-kernel f32 temporaries, capped at 75% of physical VMEM.
    w_bytes = sum(int(v.size) * jnp.dtype(v.dtype).itemsize for v in params.values())
    io_bytes = tile_n * 8 * H * itemsize                # x + dx + vec + dvec per copy
    need = (2 * w_bytes + 2 * io_bytes
            + tile_n * 3 * H * 4                        # f32 vec1 scratch
            + tile_n * 9 * H * 4                        # pd/out/h/accumulator temps
            + (4 << 20))
    try:
        phys = int(pltpu.get_tpu_info().vmem_capacity_bytes)
    except Exception:
        phys = 64 << 20                                 # conservative (v7x)
    vmem_limit = int(min(max(need, 16 << 20), (phys * 3) // 4))

    def build(single_buffer_weights):
        def wspec(shape):
            if single_buffer_weights:
                return pl.BlockSpec(shape, lambda i: (0, 0),
                                    pipeline_mode=pl.Buffered(1))
            return pl.BlockSpec(shape, lambda i: (0, 0))

        return pl.pallas_call(
            kernel,
            out_shape=(
                jax.ShapeDtypeStruct((N, H), x.dtype),
                jax.ShapeDtypeStruct((N, 3 * H), vec.dtype),
            ),
            grid=grid,
            in_specs=[row_spec, vec_spec] + [wspec(s) for s in weight_shapes],
            out_specs=(row_spec, vec_spec),
            scratch_shapes=[pltpu.VMEM((tile_n, 3 * H), jnp.float32)],
            compiler_params=pltpu.CompilerParams(
                dimension_semantics=("parallel",),
                vmem_limit_bytes=vmem_limit,
            ),
        )

    args = (x, vec_flat, params["wv"], params["w1a"], params["w1b"],
            params["b1"], params["w2"], params["b2"])
    try:
        dx, dvec_flat = build(True)(*args)
    except Exception:
        # Older JAX without per-BlockSpec pipeline_mode / Buffered(1): fall
        # back to default double-buffered weights (identical results).
        dx, dvec_flat = build(False)(*args)

    return dx, dvec_flat.reshape(N, 3, H)


def init_params(key, hidden_channels, dtype=jnp.float32):
    """Deterministic Xavier-uniform init matching PaiNNUpdate.reset_parameters."""
    H = hidden_channels
    k1, k2, k3 = jax.random.split(key, 3)

    def xavier(k, fan_in, fan_out):
        bound = math.sqrt(6.0 / (fan_in + fan_out))
        # PyTorch weight is (out, in); store the transpose so kernels do y = x @ W.
        return jax.random.uniform(k, (fan_out, fan_in), jnp.float32, -bound, bound).T

    wv = xavier(k1, H, 2 * H)        # vec_proj.weight.T    : (H, 2H)
    w1 = xavier(k2, 2 * H, H)        # xvec_proj[0].weight.T: (2H, H)
    w2 = xavier(k3, H, 3 * H)        # xvec_proj[2].weight.T: (H, 3H)
    p = {
        "wv": wv,
        "w1a": w1[:H, :], "w1b": w1[H:, :], "b1": jnp.zeros((1, H), jnp.float32),
        "w2": w2, "b2": jnp.zeros((1, 3 * H), jnp.float32),
    }
    return {k: v.astype(dtype) for k, v in p.items()}


def painn_update_ref(x, vec, p):
    """Plain-JAX reference mirroring the PyTorch forward exactly."""
    H = x.shape[-1]
    proj = vec @ p["wv"]                                   # (N, 3, 2H)
    vec1, vec2 = proj[..., :H], proj[..., H:]
    vec_dot = (vec1 * vec2).sum(axis=1) * (1.0 / math.sqrt(H))
    norm = jnp.sqrt((vec2 ** 2).sum(axis=-2) + 1e-8)
    h = x @ p["w1a"] + norm @ p["w1b"] + p["b1"]
    h = (h * jax.nn.sigmoid(h)) * SILU_SCALE
    out = h @ p["w2"] + p["b2"]
    xvec1, xvec2, xvec3 = out[:, :H], out[:, H:2 * H], out[:, 2 * H:]
    dx = (xvec1 + xvec2 * vec_dot) * (1.0 / math.sqrt(2.0))
    dvec = xvec3[:, None, :] * vec1
    return dx, dvec


if __name__ == "__main__":
    key = jax.random.PRNGKey(0)

    # (N nodes, hidden_channels, dtype, requested row tile).
    # Case 2 exercises the ragged-tail (non-divisible) grid; case 3 the bf16 path.
    cases = [
        (16, 32, jnp.float32, 256),
        (200, 64, jnp.float32, 128),
        (96, 128, jnp.bfloat16, 64),
    ]
    for (N, H, dtype, tile_n) in cases:
        kx, kv, kp, key = jax.random.split(key, 4)
        x = jax.random.normal(kx, (N, H), jnp.float32)
        vec = jax.random.normal(kv, (N, 3, H), jnp.float32)
        params = init_params(kp, H)

        x_in = x.astype(dtype)
        vec_in = vec.astype(dtype)
        p_in = {k: v.astype(dtype) for k, v in params.items()}

        dx, dvec = painn_update(x_in, vec_in, p_in, tile_n=tile_n)
        dx, dvec = jax.block_until_ready((dx, dvec))

        # Reference in f32 from the same (possibly bf16-rounded) inputs.
        dx_ref, dvec_ref = painn_update_ref(
            x_in.astype(jnp.float32), vec_in.astype(jnp.float32),
            {k: v.astype(jnp.float32) for k, v in p_in.items()})

        tol = 1e-4 if dtype == jnp.float32 else 1e-1
        assert dx.shape == (N, H) and dvec.shape == (N, 3, H), (N, H)
        assert jnp.allclose(dx.astype(jnp.float32), dx_ref,
                            atol=tol, rtol=tol), (N, H, str(dtype))
        assert jnp.allclose(dvec.astype(jnp.float32), dvec_ref,
                            atol=tol, rtol=tol), (N, H, str(dtype))

    print("KERNEL_OK")
</pallas_src>

<mosaic_0001>
module attributes {stable_mosaic.version = 11 : i64} {
  func.func @painn_update_kernel(%arg0: i32, %arg1: memref<8x32xf32, #tpu.memory_space<vmem>>, %arg2: memref<8x96xf32, #tpu.memory_space<vmem>>, %arg3: memref<32x64xf32, #tpu.memory_space<vmem>>, %arg4: memref<32x32xf32, #tpu.memory_space<vmem>>, %arg5: memref<32x32xf32, #tpu.memory_space<vmem>>, %arg6: memref<1x32xf32, #tpu.memory_space<vmem>>, %arg7: memref<32x96xf32, #tpu.memory_space<vmem>>, %arg8: memref<1x96xf32, #tpu.memory_space<vmem>>, %arg9: memref<8x32xf32, #tpu.memory_space<vmem>>, %arg10: memref<8x96xf32, #tpu.memory_space<vmem>>, %arg11: memref<8x96xf32, #tpu.memory_space<vmem>>) attributes {dimension_semantics = [#tpu.dimension_semantics<parallel>], iteration_bounds = array<i64: 2>, scalar_prefetch = 0 : i64, scratch_operands = 1 : i64, tpu.core_type = #tpu.core_type<tc>, window_params = [{transform_indices = @transform_0, window_bounds = array<i64: 8, 32>}, {transform_indices = @transform_1, window_bounds = array<i64: 8, 96>}, {pipeline_mode = #tpu.pipeline_mode<synchronous>, transform_indices = @transform_2, window_bounds = array<i64: 32, 64>}, {pipeline_mode = #tpu.pipeline_mode<synchronous>, transform_indices = @transform_3, window_bounds = array<i64: 32, 32>}, {pipeline_mode = #tpu.pipeline_mode<synchronous>, transform_indices = @transform_4, window_bounds = array<i64: 32, 32>}, {pipeline_mode = #tpu.pipeline_mode<synchronous>, transform_indices = @transform_5, window_bounds = array<i64: 1, 32>}, {pipeline_mode = #tpu.pipeline_mode<synchronous>, transform_indices = @transform_6, window_bounds = array<i64: 32, 96>}, {pipeline_mode = #tpu.pipeline_mode<synchronous>, transform_indices = @transform_7, window_bounds = array<i64: 1, 96>}, {transform_indices = @transform_8, window_bounds = array<i64: 8, 32>}, {transform_indices = @transform_9, window_bounds = array<i64: 8, 96>}]} {
    %c0 = arith.constant 0 : index
    %c0_0 = arith.constant 0 : index
    %0 = vector.load %arg3[%c0, %c0_0] : memref<32x64xf32, #tpu.memory_space<vmem>>, vector<32x64xf32>
    %cst = arith.constant 0.000000e+00 : f32
    %1 = vector.broadcast %cst : f32 to vector<8x32xf32>
    %cst_1 = arith.constant 0.000000e+00 : f32
    %2 = vector.broadcast %cst_1 : f32 to vector<8x32xf32>
    %c0_2 = arith.constant 0 : index
    %c0_3 = arith.constant 0 : index
    %3 = vector.load %arg2[%c0_2, %c0_3] : memref<8x96xf32, #tpu.memory_space<vmem>>, vector<8x32xf32>
    %cst_4 = arith.constant dense<0.000000e+00> : vector<8x64xf32>
    %4 = tpu.matmul %3, %0, %cst_4 {dimension_numbers = #tpu.dot_dimension_numbers<[1], [0], [0], [1], [0, 0, 1, 1], [], []>} : vector<8x32xf32>, vector<32x64xf32>, vector<8x64xf32> -> vector<8x64xf32>
    %5 = vector.extract_strided_slice %4 {offsets = [0, 0], sizes = [8, 32], strides = [1, 1]} : vector<8x64xf32> to vector<8x32xf32>
    %6 = vector.extract_strided_slice %4 {offsets = [0, 32], sizes = [8, 32], strides = [1, 1]} : vector<8x64xf32> to vector<8x32xf32>
    %c0_5 = arith.constant 0 : index
    %c0_6 = arith.constant 0 : index
    %7 = vector.load %arg11[%c0_5, %c0_6] : memref<8x96xf32, #tpu.memory_space<vmem>>, vector<8x32xf32>
    tpu.vector_store %arg11[%c0_5, %c0_6], %5 {strides = array<i32>} : memref<8x96xf32, #tpu.memory_space<vmem>>, vector<8x32xf32>,
    %8 = arith.mulf %5, %6 : vector<8x32xf32>
    %9 = arith.addf %1, %8 : vector<8x32xf32>
    %10 = arith.mulf %6, %6 : vector<8x32xf32>
    %11 = arith.addf %2, %10 : vector<8x32xf32>
    %c0_7 = arith.constant 0 : index
    %c32 = arith.constant 32 : index
    %12 = vector.load %arg2[%c0_7, %c32] : memref<8x96xf32, #tpu.memory_space<vmem>>, vector<8x32xf32>
    %cst_8 = arith.constant dense<0.000000e+00> : vector<8x64xf32>
    %13 = tpu.matmul %12, %0, %cst_8 {dimension_numbers = #tpu.dot_dimension_numbers<[1], [0], [0], [1], [0, 0, 1, 1], [], []>} : vector<8x32xf32>, vector<32x64xf32>, vector<8x64xf32> -> vector<8x64xf32>
    %14 = vector.extract_strided_slice %13 {offsets = [0, 0], sizes = [8, 32], strides = [1, 1]} : vector<8x64xf32> to vector<8x32xf32>
    %15 = vector.extract_strided_slice %13 {offsets = [0, 32], sizes = [8, 32], strides = [1, 1]} : vector<8x64xf32> to vector<8x32xf32>
    %c0_9 = arith.constant 0 : index
    %c32_10 = arith.constant 32 : index
    %16 = vector.load %arg11[%c0_9, %c32_10] : memref<8x96xf32, #tpu.memory_space<vmem>>, vector<8x32xf32>
    tpu.vector_store %arg11[%c0_9, %c32_10], %14 {strides = array<i32>} : memref<8x96xf32, #tpu.memory_space<vmem>>, vector<8x32xf32>,
    %17 = arith.mulf %14, %15 : vector<8x32xf32>
    %18 = arith.addf %9, %17 : vector<8x32xf32>
    %19 = arith.mulf %15, %15 : vector<8x32xf32>
    %20 = arith.addf %11, %19 : vector<8x32xf32>
    %c0_11 = arith.constant 0 : index
    %c64 = arith.constant 64 : index
    %21 = vector.load %arg2[%c0_11, %c64] : memref<8x96xf32, #tpu.memory_space<vmem>>, vector<8x32xf32>
    %cst_12 = arith.constant dense<0.000000e+00> : vector<8x64xf32>
    %22 = tpu.matmul %21, %0, %cst_12 {dimension_numbers = #tpu.dot_dimension_numbers<[1], [0], [0], [1], [0, 0, 1, 1], [], []>} : vector<8x32xf32>, vector<32x64xf32>, vector<8x64xf32> -> vector<8x64xf32>
    %23 = vector.extract_strided_slice %22 {offsets = [0, 0], sizes = [8, 32], strides = [1, 1]} : vector<8x64xf32> to vector<8x32xf32>
    %24 = vector.extract_strided_slice %22 {offsets = [0, 32], sizes = [8, 32], strides = [1, 1]} : vector<8x64xf32> to vector<8x32xf32>
    %c0_13 = arith.constant 0 : index
    %c64_14 = arith.constant 64 : index
    %25 = vector.load %arg11[%c0_13, %c64_14] : memref<8x96xf32, #tpu.memory_space<vmem>>, vector<8x32xf32>
    tpu.vector_store %arg11[%c0_13, %c64_14], %23 {strides = array<i32>} : memref<8x96xf32, #tpu.memory_space<vmem>>, vector<8x32xf32>,
    %26 = arith.mulf %23, %24 : vector<8x32xf32>
    %27 = arith.addf %18, %26 : vector<8x32xf32>
    %28 = arith.mulf %24, %24 : vector<8x32xf32>
    %29 = arith.addf %20, %28 : vector<8x32xf32>
    %cst_15 = arith.constant 0.176776692 : f32
    %30 = vector.broadcast %cst_15 : f32 to vector<8x32xf32>
    %31 = arith.mulf %27, %30 : vector<8x32xf32>
    %cst_16 = arith.constant 9.99999993E-9 : f32
    %32 = vector.broadcast %cst_16 : f32 to vector<8x32xf32>
    %33 = arith.addf %29, %32 : vector<8x32xf32>
    %34 = math.sqrt %33 : vector<8x32xf32>
    %c0_17 = arith.constant 0 : index
    %c0_18 = arith.constant 0 : index
    %35 = vector.load %arg1[%c0_17, %c0_18] : memref<8x32xf32, #tpu.memory_space<vmem>>, vector<8x32xf32>
    %c0_19 = arith.constant 0 : index
    %c0_20 = arith.constant 0 : index
    %36 = vector.load %arg4[%c0_19, %c0_20] : memref<32x32xf32, #tpu.memory_space<vmem>>, vector<32x32xf32>
    %cst_21 = arith.constant dense<0.000000e+00> : vector<8x32xf32>
    %37 = tpu.matmul %35, %36, %cst_21 {dimension_numbers = #tpu.dot_dimension_numbers<[1], [0], [0], [1], [0, 0, 1, 1], [], []>} : vector<8x32xf32>, vector<32x32xf32>, vector<8x32xf32> -> vector<8x32xf32>
    %c0_22 = arith.constant 0 : index
    %c0_23 = arith.constant 0 : index
    %38 = vector.load %arg5[%c0_22, %c0_23] : memref<32x32xf32, #tpu.memory_space<vmem>>, vector<32x32xf32>
    %cst_24 = arith.constant dense<0.000000e+00> : vector<8x32xf32>
    %39 = tpu.matmul %34, %38, %cst_24 {dimension_numbers = #tpu.dot_dimension_numbers<[1], [0], [0], [1], [0, 0, 1, 1], [], []>} : vector<8x32xf32>, vector<32x32xf32>, vector<8x32xf32> -> vector<8x32xf32>
    %40 = arith.addf %37, %39 : vector<8x32xf32>
    %c0_25 = arith.constant 0 : index
    %c0_26 = arith.constant 0 : index
    %41 = vector.load %arg6[%c0_25, %c0_26] : memref<1x32xf32, #tpu.memory_space<vmem>>, vector<1x32xf32>
    %42 = vector.broadcast %41 : vector<1x32xf32> to vector<8x32xf32>
    %43 = arith.addf %40, %42 : vector<8x32xf32>
    %cst_27 = arith.constant 0.000000e+00 : f32
    %44 = vector.broadcast %cst_27 : f32 to vector<8x32xf32>
    %45 = arith.subf %44, %43 : vector<8x32xf32>
    %46 = math.exp %45 : vector<8x32xf32>
    %cst_28 = arith.constant 1.000000e+00 : f32
    %47 = vector.broadcast %cst_28 : f32 to vector<8x32xf32>
    %48 = arith.addf %47, %46 : vector<8x32xf32>
    %49 = tpu.reciprocal %48 : vector<8x32xf32> -> vector<8x32xf32>
    %50 = arith.mulf %43, %49 : vector<8x32xf32>
    %cst_29 = arith.constant 1.66666663 : f32
    %51 = vector.broadcast %cst_29 : f32 to vector<8x32xf32>
    %52 = arith.mulf %50, %51 : vector<8x32xf32>
    %c0_30 = arith.constant 0 : index
    %c0_31 = arith.constant 0 : index
    %53 = vector.load %arg7[%c0_30, %c0_31] : memref<32x96xf32, #tpu.memory_space<vmem>>, vector<32x96xf32>
    %cst_32 = arith.constant dense<0.000000e+00> : vector<8x96xf32>
    %54 = tpu.matmul %52, %53, %cst_32 {dimension_numbers = #tpu.dot_dimension_numbers<[1], [0], [0], [1], [0, 0, 1, 1], [], []>} : vector<8x32xf32>, vector<32x96xf32>, vector<8x96xf32> -> vector<8x96xf32>
    %c0_33 = arith.constant 0 : index
    %c0_34 = arith.constant 0 : index
    %55 = vector.load %arg8[%c0_33, %c0_34] : memref<1x96xf32, #tpu.memory_space<vmem>>, vector<1x96xf32>
    %56 = vector.broadcast %55 : vector<1x96xf32> to vector<8x96xf32>
    %57 = arith.addf %54, %56 : vector<8x96xf32>
    %58 = vector.extract_strided_slice %57 {offsets = [0, 0], sizes = [8, 32], strides = [1, 1]} : vector<8x96xf32> to vector<8x32xf32>
    %59 = vector.extract_strided_slice %57 {offsets = [0, 32], sizes = [8, 32], strides = [1, 1]} : vector<8x96xf32> to vector<8x32xf32>
    %60 = vector.extract_strided_slice %57 {offsets = [0, 64], sizes = [8, 32], strides = [1, 1]} : vector<8x96xf32> to vector<8x32xf32>
    %61 = arith.mulf %59, %31 : vector<8x32xf32>
    %62 = arith.addf %58, %61 : vector<8x32xf32>
    %cst_35 = arith.constant 0.707106769 : f32
    %63 = vector.broadcast %cst_35 : f32 to vector<8x32xf32>
    %64 = arith.mulf %62, %63 : vector<8x32xf32>
    %c0_36 = arith.constant 0 : index
    %c0_37 = arith.constant 0 : index
    %65 = vector.load %arg9[%c0_36, %c0_37] : memref<8x32xf32, #tpu.memory_space<vmem>>, vector<8x32xf32>
    tpu.vector_store %arg9[%c0_36, %c0_37], %64 {strides = array<i32>} : memref<8x32xf32, #tpu.memory_space<vmem>>, vector<8x32xf32>,
    %c0_38 = arith.constant 0 : index
    %c0_39 = arith.constant 0 : index
    %66 = vector.load %arg11[%c0_38, %c0_39] : memref<8x96xf32, #tpu.memory_space<vmem>>, vector<8x32xf32>
    %67 = arith.mulf %60, %66 : vector<8x32xf32>
    %c0_40 = arith.constant 0 : index
    %c0_41 = arith.constant 0 : index
    %68 = vector.load %arg10[%c0_40, %c0_41] : memref<8x96xf32, #tpu.memory_space<vmem>>, vector<8x32xf32>
    tpu.vector_store %arg10[%c0_40, %c0_41], %67 {strides = array<i32>} : memref<8x96xf32, #tpu.memory_space<vmem>>, vector<8x32xf32>,
    %c0_42 = arith.constant 0 : index
    %c32_43 = arith.constant 32 : index
    %69 = vector.load %arg11[%c0_42, %c32_43] : memref<8x96xf32, #tpu.memory_space<vmem>>, vector<8x32xf32>
    %70 = arith.mulf %60, %69 : vector<8x32xf32>
    %c0_44 = arith.constant 0 : index
    %c32_45 = arith.constant 32 : index
    %71 = vector.load %arg10[%c0_44, %c32_45] : memref<8x96xf32, #tpu.memory_space<vmem>>, vector<8x32xf32>
    tpu.vector_store %arg10[%c0_44, %c32_45], %70 {strides = array<i32>} : memref<8x96xf32, #tpu.memory_space<vmem>>, vector<8x32xf32>,
    %c0_46 = arith.constant 0 : index
    %c64_47 = arith.constant 64 : index
    %72 = vector.load %arg11[%c0_46, %c64_47] : memref<8x96xf32, #tpu.memory_space<vmem>>, vector<8x32xf32>
    %73 = arith.mulf %60, %72 : vector<8x32xf32>
    %c0_48 = arith.constant 0 : index
    %c64_49 = arith.constant 64 : index
    %74 = vector.load %arg10[%c0_48, %c64_49] : memref<8x96xf32, #tpu.memory_space<vmem>>, vector<8x32xf32>
    tpu.vector_store %arg10[%c0_48, %c64_49], %73 {strides = array<i32>} : memref<8x96xf32, #tpu.memory_space<vmem>>, vector<8x32xf32>,
    return
  }
  func.func @transform_0(%arg0: i32) -> (i32, i32) {
    %c0_i32 = arith.constant 0 : i32
    %c0_i32_0 = arith.constant 0 : i32
    return %arg0, %c0_i32 : i32, i32
  }
  func.func @transform_1(%arg0: i32) -> (i32, i32) {
    %c0_i32 = arith.constant 0 : i32
    %c0_i32_0 = arith.constant 0 : i32
    return %arg0, %c0_i32 : i32, i32
  }
  func.func @transform_2(%arg0: i32) -> (i32, i32) {
    %c0_i32 = arith.constant 0 : i32
    %c0_i32_0 = arith.constant 0 : i32
    %c0_i32_1 = arith.constant 0 : i32
    return %c0_i32, %c0_i32_0 : i32, i32
  }
  func.func @transform_3(%arg0: i32) -> (i32, i32) {
    %c0_i32 = arith.constant 0 : i32
    %c0_i32_0 = arith.constant 0 : i32
    %c0_i32_1 = arith.constant 0 : i32
    return %c0_i32, %c0_i32_0 : i32, i32
  }
  func.func @transform_4(%arg0: i32) -> (i32, i32) {
    %c0_i32 = arith.constant 0 : i32
    %c0_i32_0 = arith.constant 0 : i32
    %c0_i32_1 = arith.constant 0 : i32
    return %c0_i32, %c0_i32_0 : i32, i32
  }
  func.func @transform_5(%arg0: i32) -> (i32, i32) {
    %c0_i32 = arith.constant 0 : i32
    %c0_i32_0 = arith.constant 0 : i32
    %c0_i32_1 = arith.constant 0 : i32
    return %c0_i32, %c0_i32_0 : i32, i32
  }
  func.func @transform_6(%arg0: i32) -> (i32, i32) {
    %c0_i32 = arith.constant 0 : i32
    %c0_i32_0 = arith.constant 0 : i32
    %c0_i32_1 = arith.constant 0 : i32
    return %c0_i32, %c0_i32_0 : i32, i32
  }
  func.func @transform_7(%arg0: i32) -> (i32, i32) {
    %c0_i32 = arith.constant 0 : i32
    %c0_i32_0 = arith.constant 0 : i32
    %c0_i32_1 = arith.constant 0 : i32
    return %c0_i32, %c0_i32_0 : i32, i32
  }
  func.func @transform_8(%arg0: i32) -> (i32, i32) {
    %c0_i32 = arith.constant 0 : i32
    %c0_i32_0 = arith.constant 0 : i32
    return %arg0, %c0_i32 : i32, i32
  }
  func.func @transform_9(%arg0: i32) -> (i32, i32) {
    %c0_i32 = arith.constant 0 : i32
    %c0_i32_0 = arith.constant 0 : i32
    return %arg0, %c0_i32 : i32, i32
  }
}

module attributes {stable_mosaic.version = 11 : i64} {
  func.func @painn_update_kernel(%arg0: i32, %arg1: memref<8x32xf32, #tpu.memory_space<vmem>>, %arg2: memref<8x96xf32, #tpu.memory_space<vmem>>, %arg3: memref<32x64xf32, #tpu.memory_space<vmem>>, %arg4: memref<32x32xf32, #tpu.memory_space<vmem>>, %arg5: memref<32x32xf32, #tpu.memory_space<vmem>>, %arg6: memref<1x32xf32, #tpu.memory_space<vmem>>, %arg7: memref<32x96xf32, #tpu.memory_space<vmem>>, %arg8: memref<1x96xf32, #tpu.memory_space<vmem>>, %arg9: memref<8x32xf32, #tpu.memory_space<vmem>>, %arg10: memref<8x96xf32, #tpu.memory_space<vmem>>, %arg11: memref<8x96xf32, #tpu.memory_space<vmem>>) attributes {dimension_semantics = [#tpu.dimension_semantics<parallel>], iteration_bounds = array<i64: 2>, scalar_prefetch = 0 : i64, scratch_operands = 1 : i64, tpu.core_type = #tpu.core_type<tc>, window_params = [{transform_indices = @transform_0, window_bounds = array<i64: 8, 32>}, {transform_indices = @transform_1, window_bounds = array<i64: 8, 96>}, {pipeline_mode = #tpu.pipeline_mode<synchronous>, transform_indices = @transform_2, window_bounds = array<i64: 32, 64>}, {pipeline_mode = #tpu.pipeline_mode<synchronous>, transform_indices = @transform_3, window_bounds = array<i64: 32, 32>}, {pipeline_mode = #tpu.pipeline_mode<synchronous>, transform_indices = @transform_4, window_bounds = array<i64: 32, 32>}, {pipeline_mode = #tpu.pipeline_mode<synchronous>, transform_indices = @transform_5, window_bounds = array<i64: 1, 32>}, {pipeline_mode = #tpu.pipeline_mode<synchronous>, transform_indices = @transform_6, window_bounds = array<i64: 32, 96>}, {pipeline_mode = #tpu.pipeline_mode<synchronous>, transform_indices = @transform_7, window_bounds = array<i64: 1, 96>}, {transform_indices = @transform_8, window_bounds = array<i64: 8, 32>}, {transform_indices = @transform_9, window_bounds = array<i64: 8, 96>}]} {
    %c0 = arith.constant 0 : index
    %c0_0 = arith.constant 0 : index
    %0 = vector.load %arg3[%c0, %c0_0] : memref<32x64xf32, #tpu.memory_space<vmem>>, vector<32x64xf32>
    %cst = arith.constant 0.000000e+00 : f32
    %1 = vector.broadcast %cst : f32 to vector<8x32xf32>
    %cst_1 = arith.constant 0.000000e+00 : f32
    %2 = vector.broadcast %cst_1 : f32 to vector<8x32xf32>
    %c0_2 = arith.constant 0 : index
    %c0_3 = arith.constant 0 : index
    %3 = vector.load %arg2[%c0_2, %c0_3] : memref<8x96xf32, #tpu.memory_space<vmem>>, vector<8x32xf32>
    %cst_4 = arith.constant dense<0.000000e+00> : vector<8x64xf32>
    %4 = tpu.matmul %3, %0, %cst_4 {dimension_numbers = #tpu.dot_dimension_numbers<[1], [0], [0], [1], [0, 0, 1, 1], [], []>} : vector<8x32xf32>, vector<32x64xf32>, vector<8x64xf32> -> vector<8x64xf32>
    %5 = vector.extract_strided_slice %4 {offsets = [0, 0], sizes = [8, 32], strides = [1, 1]} : vector<8x64xf32> to vector<8x32xf32>
    %6 = vector.extract_strided_slice %4 {offsets = [0, 32], sizes = [8, 32], strides = [1, 1]} : vector<8x64xf32> to vector<8x32xf32>
    %c0_5 = arith.constant 0 : index
    %c0_6 = arith.constant 0 : index
    %7 = vector.load %arg11[%c0_5, %c0_6] : memref<8x96xf32, #tpu.memory_space<vmem>>, vector<8x32xf32>
    tpu.vector_store %arg11[%c0_5, %c0_6], %5 {strides = array<i32>} : memref<8x96xf32, #tpu.memory_space<vmem>>, vector<8x32xf32>,
    %8 = arith.mulf %5, %6 : vector<8x32xf32>
    %9 = arith.addf %1, %8 : vector<8x32xf32>
    %10 = arith.mulf %6, %6 : vector<8x32xf32>
    %11 = arith.addf %2, %10 : vector<8x32xf32>
    %c0_7 = arith.constant 0 : index
    %c32 = arith.constant 32 : index
    %12 = vector.load %arg2[%c0_7, %c32] : memref<8x96xf32, #tpu.memory_space<vmem>>, vector<8x32xf32>
    %cst_8 = arith.constant dense<0.000000e+00> : vector<8x64xf32>
    %13 = tpu.matmul %12, %0, %cst_8 {dimension_numbers = #tpu.dot_dimension_numbers<[1], [0], [0], [1], [0, 0, 1, 1], [], []>} : vector<8x32xf32>, vector<32x64xf32>, vector<8x64xf32> -> vector<8x64xf32>
    %14 = vector.extract_strided_slice %13 {offsets = [0, 0], sizes = [8, 32], strides = [1, 1]} : vector<8x64xf32> to vector<8x32xf32>
    %15 = vector.extract_strided_slice %13 {offsets = [0, 32], sizes = [8, 32], strides = [1, 1]} : vector<8x64xf32> to vector<8x32xf32>
    %c0_9 = arith.constant 0 : index
    %c32_10 = arith.constant 32 : index
    %16 = vector.load %arg11[%c0_9, %c32_10] : memref<8x96xf32, #tpu.memory_space<vmem>>, vector<8x32xf32>
    tpu.vector_store %arg11[%c0_9, %c32_10], %14 {strides = array<i32>} : memref<8x96xf32, #tpu.memory_space<vmem>>, vector<8x32xf32>,
    %17 = arith.mulf %14, %15 : vector<8x32xf32>
    %18 = arith.addf %9, %17 : vector<8x32xf32>
    %19 = arith.mulf %15, %15 : vector<8x32xf32>
    %20 = arith.addf %11, %19 : vector<8x32xf32>
    %c0_11 = arith.constant 0 : index
    %c64 = arith.constant 64 : index
    %21 = vector.load %arg2[%c0_11, %c64] : memref<8x96xf32, #tpu.memory_space<vmem>>, vector<8x32xf32>
    %cst_12 = arith.constant dense<0.000000e+00> : vector<8x64xf32>
    %22 = tpu.matmul %21, %0, %cst_12 {dimension_numbers = #tpu.dot_dimension_numbers<[1], [0], [0], [1], [0, 0, 1, 1], [], []>} : vector<8x32xf32>, vector<32x64xf32>, vector<8x64xf32> -> vector<8x64xf32>
    %23 = vector.extract_strided_slice %22 {offsets = [0, 0], sizes = [8, 32], strides = [1, 1]} : vector<8x64xf32> to vector<8x32xf32>
    %24 = vector.extract_strided_slice %22 {offsets = [0, 32], sizes = [8, 32], strides = [1, 1]} : vector<8x64xf32> to vector<8x32xf32>
    %c0_13 = arith.constant 0 : index
    %c64_14 = arith.constant 64 : index
    %25 = vector.load %arg11[%c0_13, %c64_14] : memref<8x96xf32, #tpu.memory_space<vmem>>, vector<8x32xf32>
    tpu.vector_store %arg11[%c0_13, %c64_14], %23 {strides = array<i32>} : memref<8x96xf32, #tpu.memory_space<vmem>>, vector<8x32xf32>,
    %26 = arith.mulf %23, %24 : vector<8x32xf32>
    %27 = arith.addf %18, %26 : vector<8x32xf32>
    %28 = arith.mulf %24, %24 : vector<8x32xf32>
    %29 = arith.addf %20, %28 : vector<8x32xf32>
    %cst_15 = arith.constant 0.176776692 : f32
    %30 = vector.broadcast %cst_15 : f32 to vector<8x32xf32>
    %31 = arith.mulf %27, %30 : vector<8x32xf32>
    %cst_16 = arith.constant 9.99999993E-9 : f32
    %32 = vector.broadcast %cst_16 : f32 to vector<8x32xf32>
    %33 = arith.addf %29, %32 : vector<8x32xf32>
    %34 = math.sqrt %33 : vector<8x32xf32>
    %c0_17 = arith.constant 0 : index
    %c0_18 = arith.constant 0 : index
    %35 = vector.load %arg1[%c0_17, %c0_18] : memref<8x32xf32, #tpu.memory_space<vmem>>, vector<8x32xf32>
    %c0_19 = arith.constant 0 : index
    %c0_20 = arith.constant 0 : index
    %36 = vector.load %arg4[%c0_19, %c0_20] : memref<32x32xf32, #tpu.memory_space<vmem>>, vector<32x32xf32>
    %cst_21 = arith.constant dense<0.000000e+00> : vector<8x32xf32>
    %37 = tpu.matmul %35, %36, %cst_21 {dimension_numbers = #tpu.dot_dimension_numbers<[1], [0], [0], [1], [0, 0, 1, 1], [], []>} : vector<8x32xf32>, vector<32x32xf32>, vector<8x32xf32> -> vector<8x32xf32>
    %c0_22 = arith.constant 0 : index
    %c0_23 = arith.constant 0 : index
    %38 = vector.load %arg5[%c0_22, %c0_23] : memref<32x32xf32, #tpu.memory_space<vmem>>, vector<32x32xf32>
    %cst_24 = arith.constant dense<0.000000e+00> : vector<8x32xf32>
    %39 = tpu.matmul %34, %38, %cst_24 {dimension_numbers = #tpu.dot_dimension_numbers<[1], [0], [0], [1], [0, 0, 1, 1], [], []>} : vector<8x32xf32>, vector<32x32xf32>, vector<8x32xf32> -> vector<8x32xf32>
    %40 = arith.addf %37, %39 : vector<8x32xf32>
    %c0_25 = arith.constant 0 : index
    %c0_26 = arith.constant 0 : index
    %41 = vector.load %arg6[%c0_25, %c0_26] : memref<1x32xf32, #tpu.memory_space<vmem>>, vector<1x32xf32>
    %42 = vector.broadcast %41 : vector<1x32xf32> to vector<8x32xf32>
    %43 = arith.addf %40, %42 : vector<8x32xf32>
    %cst_27 = arith.constant 0.000000e+00 : f32
    %44 = vector.broadcast %cst_27 : f32 to vector<8x32xf32>
    %45 = arith.subf %44, %43 : vector<8x32xf32>
    %46 = math.exp %45 : vector<8x32xf32>
    %cst_28 = arith.constant 1.000000e+00 : f32
    %47 = vector.broadcast %cst_28 : f32 to vector<8x32xf32>
    %48 = arith.addf %47, %46 : vector<8x32xf32>
    %49 = tpu.reciprocal %48 : vector<8x32xf32> -> vector<8x32xf32>
    %50 = arith.mulf %43, %49 : vector<8x32xf32>
    %cst_29 = arith.constant 1.66666663 : f32
    %51 = vector.broadcast %cst_29 : f32 to vector<8x32xf32>
    %52 = arith.mulf %50, %51 : vector<8x32xf32>
    %c0_30 = arith.constant 0 : index
    %c0_31 = arith.constant 0 : index
    %53 = vector.load %arg7[%c0_30, %c0_31] : memref<32x96xf32, #tpu.memory_space<vmem>>, vector<32x96xf32>
    %cst_32 = arith.constant dense<0.000000e+00> : vector<8x96xf32>
    %54 = tpu.matmul %52, %53, %cst_32 {dimension_numbers = #tpu.dot_dimension_numbers<[1], [0], [0], [1], [0, 0, 1, 1], [], []>} : vector<8x32xf32>, vector<32x96xf32>, vector<8x96xf32> -> vector<8x96xf32>
    %c0_33 = arith.constant 0 : index
    %c0_34 = arith.constant 0 : index
    %55 = vector.load %arg8[%c0_33, %c0_34] : memref<1x96xf32, #tpu.memory_space<vmem>>, vector<1x96xf32>
    %56 = vector.broadcast %55 : vector<1x96xf32> to vector<8x96xf32>
    %57 = arith.addf %54, %56 : vector<8x96xf32>
    %58 = vector.extract_strided_slice %57 {offsets = [0, 0], sizes = [8, 32], strides = [1, 1]} : vector<8x96xf32> to vector<8x32xf32>
    %59 = vector.extract_strided_slice %57 {offsets = [0, 32], sizes = [8, 32], strides = [1, 1]} : vector<8x96xf32> to vector<8x32xf32>
    %60 = vector.extract_strided_slice %57 {offsets = [0, 64], sizes = [8, 32], strides = [1, 1]} : vector<8x96xf32> to vector<8x32xf32>
    %61 = arith.mulf %59, %31 : vector<8x32xf32>
    %62 = arith.addf %58, %61 : vector<8x32xf32>
    %cst_35 = arith.constant 0.707106769 : f32
    %63 = vector.broadcast %cst_35 : f32 to vector<8x32xf32>
    %64 = arith.mulf %62, %63 : vector<8x32xf32>
    %c0_36 = arith.constant 0 : index
    %c0_37 = arith.constant 0 : index
    %65 = vector.load %arg9[%c0_36, %c0_37] : memref<8x32xf32, #tpu.memory_space<vmem>>, vector<8x32xf32>
    tpu.vector_store %arg9[%c0_36, %c0_37], %64 {strides = array<i32>} : memref<8x32xf32, #tpu.memory_space<vmem>>, vector<8x32xf32>,
    %c0_38 = arith.constant 0 : index
    %c0_39 = arith.constant 0 : index
    %66 = vector.load %arg11[%c0_38, %c0_39] : memref<8x96xf32, #tpu.memory_space<vmem>>, vector<8x32xf32>
    %67 = arith.mulf %60, %66 : vector<8x32xf32>
    %c0_40 = arith.constant 0 : index
    %c0_41 = arith.constant 0 : index
    %68 = vector.load %arg10[%c0_40, %c0_41] : memref<8x96xf32, #tpu.memory_space<vmem>>, vector<8x32xf32>
    tpu.vector_store %arg10[%c0_40, %c0_41], %67 {strides = array<i32>} : memref<8x96xf32, #tpu.memory_space<vmem>>, vector<8x32xf32>,
    %c0_42 = arith.constant 0 : index
    %c32_43 = arith.constant 32 : index
    %69 = vector.load %arg11[%c0_42, %c32_43] : memref<8x96xf32, #tpu.memory_space<vmem>>, vector<8x32xf32>
    %70 = arith.mulf %60, %69 : vector<8x32xf32>
    %c0_44 = arith.constant 0 : index
    %c32_45 = arith.constant 32 : index
    %71 = vector.load %arg10[%c0_44, %c32_45] : memref<8x96xf32, #tpu.memory_space<vmem>>, vector<8x32xf32>
    tpu.vector_store %arg10[%c0_44, %c32_45], %70 {strides = array<i32>} : memref<8x96xf32, #tpu.memory_space<vmem>>, vector<8x32xf32>,
    %c0_46 = arith.constant 0 : index
    %c64_47 = arith.constant 64 : index
    %72 = vector.load %arg11[%c0_46, %c64_47] : memref<8x96xf32, #tpu.memory_space<vmem>>, vector<8x32xf32>
    %73 = arith.mulf %60, %72 : vector<8x32xf32>
    %c0_48 = arith.constant 0 : index
    %c64_49 = arith.constant 64 : index
    %74 = vector.load %arg10[%c0_48, %c64_49] : memref<8x96xf32, #tpu.memory_space<vmem>>, vector<8x32xf32>
    tpu.vector_store %arg10[%c0_48, %c64_49], %73 {strides = array<i32>} : memref<8x96xf32, #tpu.memory_space<vmem>>, vector<8x32xf32>,
    return
  }
  func.func @transform_0(%arg0: i32) -> (i32, i32) {
    %c0_i32 = arith.constant 0 : i32
    %c0_i32_0 = arith.constant 0 : i32
    return %arg0, %c0_i32 : i32, i32
  }
  func.func @transform_1(%arg0: i32) -> (i32, i32) {
    %c0_i32 = arith.constant 0 : i32
    %c0_i32_0 = arith.constant 0 : i32
    return %arg0, %c0_i32 : i32, i32
  }
  func.func @transform_2(%arg0: i32) -> (i32, i32) {
    %c0_i32 = arith.constant 0 : i32
    %c0_i32_0 = arith.constant 0 : i32
    %c0_i32_1 = arith.constant 0 : i32
    return %c0_i32, %c0_i32_0 : i32, i32
  }
  func.func @transform_3(%arg0: i32) -> (i32, i32) {
    %c0_i32 = arith.constant 0 : i32
    %c0_i32_0 = arith.constant 0 : i32
    %c0_i32_1 = arith.constant 0 : i32
    return %c0_i32, %c0_i32_0 : i32, i32
  }
  func.func @transform_4(%arg0: i32) -> (i32, i32) {
    %c0_i32 = arith.constant 0 : i32
    %c0_i32_0 = arith.constant 0 : i32
    %c0_i32_1 = arith.constant 0 : i32
    return %c0_i32, %c0_i32_0 : i32, i32
  }
  func.func @transform_5(%arg0: i32) -> (i32, i32) {
    %c0_i32 = arith.constant 0 : i32
    %c0_i32_0 = arith.constant 0 : i32
    %c0_i32_1 = arith.constant 0 : i32
    return %c0_i32, %c0_i32_0 : i32, i32
  }
  func.func @transform_6(%arg0: i32) -> (i32, i32) {
    %c0_i32 = arith.constant 0 : i32
    %c0_i32_0 = arith.constant 0 : i32
    %c0_i32_1 = arith.constant 0 : i32
    return %c0_i32, %c0_i32_0 : i32, i32
  }
  func.func @transform_7(%arg0: i32) -> (i32, i32) {
    %c0_i32 = arith.constant 0 : i32
    %c0_i32_0 = arith.constant 0 : i32
    %c0_i32_1 = arith.constant 0 : i32
    return %c0_i32, %c0_i32_0 : i32, i32
  }
  func.func @transform_8(%arg0: i32) -> (i32, i32) {
    %c0_i32 = arith.constant 0 : i32
    %c0_i32_0 = arith.constant 0 : i32
    return %arg0, %c0_i32 : i32, i32
  }
  func.func @transform_9(%arg0: i32) -> (i32, i32) {
    %c0_i32 = arith.constant 0 : i32
    %c0_i32_0 = arith.constant 0 : i32
    return %arg0, %c0_i32 : i32, i32
  }
}

</mosaic_0001>

<bundles_post_ra>
// kernel: tpu_custom_call.1
= control target key start
LH: loop header
LB: loop body
LE: loop exit
PB: predicated region body
PF: predicated region fallthrough
CT: control target
= control target key end

     0   :  { %s1707_s0 = inlined_call_operand.hbm [shape: f32[16,32], index: 0, kind: input, shape index: {}]   ;;  %s1708_s1 = inlined_call_operand.hbm [shape: f32[16,96], index: 1, kind: input, shape index: {}]   ;;  %s1709_s2 = inlined_call_operand.hbm [shape: f32[32,64], index: 2, kind: input, shape index: {}]   ;;  %s1710_s3 = inlined_call_operand.hbm [shape: f32[32,32], index: 3, kind: input, shape index: {}]   ;;  %s1711_s4 = inlined_call_operand.hbm [shape: f32[32,32], index: 4, kind: input, shape index: {}]   ;;  %s1712_s5 = inlined_call_operand.vmem [shape: f32[1,32], index: 5, kind: input, shape index: {}]   ;;  %s1713_s6 = inlined_call_operand.hbm [shape: f32[32,96], index: 6, kind: input, shape index: {}]   ;;  %s1714_s7 = inlined_call_operand.vmem [shape: f32[1,96], index: 7, kind: input, shape index: {}]   ;;  %s1715_s8 = inlined_call_operand.hbm [shape: f32[16,32], index: 8, kind: output, shape index: {0}]   ;;  %s1716_s9 = inlined_call_operand.hbm [shape: f32[16,96], index: 9, kind: output, shape index: {1}]  }
   0x1   :  { %1721 = sst [smem:[#allocation28_spill]] %s1709_s2 }
   0x2   :  { %1722 = sst [smem:[#allocation29_spill]] %s1710_s3 }
   0x3   :  { %1723 = sst [smem:[#allocation30_spill]] %s1711_s4 }
   0x4   :  { %1724 = sst [smem:[#allocation31_spill]] %s1713_s6 }
   0x5   :  { %15 = vsyncpa [#allocation4], 0 }
   0x6   :  { %17 = vsyncpa [#allocation4 + $0x1], 0 }
   0x7   :  { %18 = vsyncpa [#allocation7], 0 }
   0x8   :  { %20 = vsyncpa [#allocation7 + $0x1], 0 }
   0x9   :  { %21 = vsyncpa [#allocation10], 0 }
   0xa   :  { %22 = vsyncpa [#allocation13], 0 }
   0xb   :  { %23 = vsyncpa [#allocation5], 0 }
   0xc   :  { %25 = vsyncpa [#allocation5 + $0x1], 0 }
   0xd   :  { %26 = vsyncpa [#allocation16], 0 }
   0xe   :  { %28 = vsyncpa [#allocation16 + $0x1], 0  ;;  %s1442_s30 = smov 0   ;;  %s1444_s10 = smov 0  }
   0xf   :  { %s1446_s11 = smov 0   ;;  %s1448_s12 = smov 0  }
  0x10 LB: > { %1725 = sst [smem:[#allocation24_spill]] %s1377_s11  ;;  %s1466_s16 = sadd.s32 4294967295, %s1381_s12   ;;  %s1381_s12 = sphi %s1448_s12, %s1742_s12   ;;  %s1377_s11 = sphi %s1446_s11, %s1744_s11   ;;  %s1373_s10 = sphi %s1444_s10, %s1746_s10   ;;  %s1369_s30 = sphi %s1442_s30, %s1745_s30  }
  0x11   : > { %1726 = sst [smem:[#allocation25_spill]] %s1381_s12  ;;  %p946_p0 = scmp.ge.s32.totalorder %s1381_s12, 1 }
  0x12   : > { %s1727_s2 = sld [smem:[#allocation28_spill]]  ;;  %p55_p1 = scmp.eq.s32.totalorder %s1466_s16, 0 }
  0x13   : > { %p269_p2 = scmp.lt.s32.totalorder %s1381_s12, 3  ;;  %s1383_s18 = smov [#allocation8]  }
  0x14   : > { %s282_s19 = sshll.u32 %s1383_s18, 4  ;;  %s1729_s3 = sld [smem:[#allocation29_spill]]  ;;  %s283_s19 = int_to_ptr.vmem [resolvable:$true] %s282_s19 }
  0x15   : > { %p1471_p3 = pnand %p946_p0, %p269_p2  ;;  %s1731_s4 = sld [smem:[#allocation30_spill]] }
  0x16   : > { %s1384_s27 = smov [#allocation9]   ;;  %s1385_s29 = smov 128  }
  0x17   : > { %p1001_p4 = pneg %p1471_p3  ;;  %s296_s28 = sshll.u32 %s1384_s27, 4  ;;  %s297_s28 = int_to_ptr.vmem [resolvable:$true] %s296_s28 }
  0x18   : > { %s280_s15 = sshll.u32 %s1727_s2, 4  ;;  %s1386_s13 = smov 8   ;;  %s281_s15 = int_to_ptr.hbm [resolvable:$true] %s280_s15 }
  0x19   : > { %p1483_p6 = pnand %p1001_p4, %p55_p1  ;;  %s1732_s6 = sld [smem:[#allocation31_spill]] }
  0x1a   : > { %s294_s22 = sshll.u32 %s1729_s3, 4  ;;  %s1387_s21 = smov [#allocation11]   ;;  %s295_s22 = int_to_ptr.hbm [resolvable:$true] %s294_s22 }
  0x1b   : > { %s308_s26 = sshll.u32 %s1731_s4, 4  ;;  %s310_s24 = sshll.u32 %s1387_s21, 4  ;;  %s309_s26 = int_to_ptr.hbm [resolvable:$true] %s308_s26  ;;  %s311_s24 = int_to_ptr.vmem [resolvable:$true] %s310_s24 }
  0x1c   : > { %1004 = dma.hbm_to_vmem [thread:$0]  (!%p1483_p6), %s281_s15, 512, %s283_s19, [#allocation7], %s1385_s29, %s1385_s29, %s1386_s13  }
  0x1d   : > { %1007 = dma.hbm_to_vmem [thread:$0]  (!%p1483_p6), %s295_s22, 512, %s297_s28, [#allocation10], %s1385_s29, %s1385_s29, %s1386_s13  }
  0x1e   : > { %1010 = dma.hbm_to_vmem [thread:$0]  (!%p1483_p6), %s309_s26, 512, %s311_s24, [#allocation10], %s1385_s29, %s1385_s29, %s1386_s13  }
  0x1f   : > { %s325_s20 = sshll.u32 %s1732_s6, 4  ;;  %s1388_s15 = smov [#allocation12]   ;;  %s326_s20 = int_to_ptr.hbm [resolvable:$true] %s325_s20 }
  0x20   : > { %s327_s19 = sshll.u32 %s1388_s15, 4  ;;  %s945_s22 = sadd.s32 4294967294, %s1381_s12   ;;  %s328_s19 = int_to_ptr.vmem [resolvable:$true] %s327_s19 }
  0x21   : > { %1013 = dma.hbm_to_vmem [thread:$0]  (!%p1483_p6), %s326_s20, 512, %s328_s19, [#allocation13], %s1385_s29, %s1385_s29, %s1386_s13  }
  0x22   : > { %s1503_s25 = sadd.s32 1, %s1381_s12   ;;  %s41_s28 = sadd.s32 1, %s1377_s11 }
  0x23   : > { %1733 = sst [smem:[#allocation26_spill]] %s1503_s25  ;;  %s38_s27 = ssub.s32 %s1381_s12, %s1503_s25 }
  0x24   : > { %p39_p7 = scmp.eq.s32.totalorder %s38_s27, 0  ;;  %p48_p8 = scmp.ne.s32.totalorder %s1377_s11, %s1373_s10 }
  0x25   : > { %p49_p9 = scmp.eq.s32.totalorder %s1381_s12, 0  ;;  %p54_p10 = scmp.ne.s32.totalorder %s1373_s10, %s1369_s30 }
  0x26   : > { %s1514_s26 = scalar_select %p39_p7, %s1377_s11, %s41_s28  }
  0x27   : > { %p1516_p11 = por %p49_p9, %p48_p8  ;;  %p1522_p12 = por %p55_p1, %p54_p10 }
  0x28   : > { %1734 = sst [smem:[#allocation27_spill]] %s1514_s26  ;;  %p230_p13 = scmp.eq.s32.totalorder %s1466_s16, 1 }
  0x29   : > { %p236_p0 = scmp.eq.s32.totalorder %s945_s22, 1  ;;  %p1032_p2 = scmp.lt.s32.totalorder %s1381_s12, 2 }
  0x2a   : > { %s344_s29 = sand.u32 1, %s1377_s11   ;;  %p1529_p4 = por %p230_p13, %p48_p8 }
  0x2b   : > { %p1533_p6 = por %p236_p0, %p54_p10  ;;  %s1537_s20 = sshll.u32 %s344_s29, 3 }
  0x2c   : > { %s953_s21 = sshll.u32 %s1381_s12, 3  ;;  %s348_s27 = scalar_lea.vmem [#allocation3], %s1537_s20 }
  0x2d   : > { %s352_s19 = scalar_lea.hbm %s1707_s0, %s953_s21  ;;  %s356_s22 = sshll.u32 %s348_s27, 4  ;;  %s357_s22 = int_to_ptr.vmem [resolvable:$true] %s356_s22 }
  0x2e   : > { %s354_s28 = sshll.u32 %s352_s19, 4  ;;  %p1546_p7 = pnand %p1032_p2, %p1516_p11  ;;  %s355_s28 = int_to_ptr.hbm [resolvable:$true] %s354_s28 }
  0x2f   : > { %s371_s6 = scalar_lea.hbm %s1708_s1, %s953_s21  ;;  %s363_s26 = sand.u32 1, %s1381_s12  }
  0x30   : > { %s345_s11 = scalar_lea.sflag [#allocation4], %s344_s29  ;;  %s1207_s24 = sshra.s32 %s355_s28, 4  ;;  %s1208_s24 = int_to_ptr.hbm [resolvable:$true] %s1207_s24 }
  0x31   : > { %s1209_s15 = scalar_lea.hbm %s1208_s24, 8  ;;  %p1211_p9 = pneg %p1546_p7 }
  0x32   : > { %p1210_p8 = scmp.ne.s32.totalorder %s1208_s24, %s1209_s15  ;;  %s1214_s27 = scalar_lea.hbm %s1707_s0, 16 }
  0x33   : > { %p1215_p13 = scmp.lt.s32.totalorder %s1208_s24, %s1707_s0  ;;  %p1216_p0 = scmp.lt.s32.totalorder %s1214_s27, %s1209_s15 }
  0x34   : > { %p1212_p10 = pnand %p1211_p9, %p1210_p8 }
  0x35   : > { %p1217_p2 = por %p1216_p0, %p1215_p13 }
  0x36   : > { %p1213_p11 = pneg %p1212_p10 }
  0x38   : > { %p1218_p5 = pnand %p1217_p2, %p1213_p11 }
  0x3a   : > { %1221 = shalt.err (!%p1218_p5)
}
  0x3b   : > { %1017 = dma.hbm_to_vmem [thread:$0]  (!%p1546_p7), %s355_s28, 128, %s357_s22, %s345_s11  }
  0x3c   : > { %s373_s29 = sshll.u32 %s371_s6, 4  ;;  %s367_s21 = scalar_lea.vmem [#allocation6], %s1537_s20  ;;  %s374_s29 = int_to_ptr.hbm [resolvable:$true] %s373_s29 }
  0x3d   : > { %s375_s25 = sshll.u32 %s367_s21, 4  ;;  %s364_s14 = scalar_lea.sflag [#allocation7], %s363_s26  ;;  %s376_s25 = int_to_ptr.vmem [resolvable:$true] %s375_s25 }
  0x3e   : > { %s1237_s19 = sshra.s32 %s374_s29, 4  ;;  %s1244_s27 = scalar_lea.hbm %s1708_s1, 16  ;;  %s1238_s19 = int_to_ptr.hbm [resolvable:$true] %s1237_s19 }
  0x3f   : > { %s1239_s12 = scalar_lea.hbm %s1238_s19, 8  ;;  %p1245_p5 = scmp.lt.s32.totalorder %s1238_s19, %s1708_s1 }
  0x40   : > { %p1240_p8 = scmp.ne.s32.totalorder %s1238_s19, %s1239_s12  ;;  %p1246_p13 = scmp.lt.s32.totalorder %s1244_s27, %s1239_s12 }
  0x42   : > { %p1242_p10 = pnand %p1240_p8, %p1211_p9  ;;  %p1247_p0 = por %p1246_p13, %p1245_p5 }
  0x44   : > { %p1243_p11 = pneg %p1242_p10 }
  0x46   : > { %p1248_p2 = pnand %p1247_p0, %p1243_p11 }
  0x48   : > { %1251 = shalt.err (!%p1248_p2)
}
  0x49   : > { %1020 = dma.hbm_to_vmem [thread:$0]  (!%p1546_p7), %s374_s29, 128, %s376_s25, %s364_s14  }
  0x4a   : > { %384 = sbr.rel (%p1471_p3) target bundleno = 904 (0x388), region = 52  ;;  %s1582_s6 = sand.u32 (!%p1471_p3), 1, %s1373_s10  }
  0x4b   : > { %s1585_s26 = sshll.u32 (!%p1471_p3), %s1582_s6, 3  ;;  %s387_s20 = scalar_lea.sflag (!%p1471_p3), [#allocation4], %s1582_s6 }
  0x4c   : > { %s390_s12 = scalar_lea.vmem (!%p1471_p3), [#allocation3], %s1585_s26 }
  0x4f   : > { %1340 = dma.done.wait (%p1522_p12), %s387_s20, 128  }
  0x50   : > { %1342 = vsyncadd (%p1522_p12), %s387_s20, 4294967168  ;;  %s396_s2 = sand.u32 1, %s1466_s16   ;;  %s400_s25 = scalar_lea.vmem [#allocation6], %s1585_s26 }
  0x51   : > { %s397_s17 = scalar_lea.sflag [#allocation7], %s396_s2 }
  0x52   : > { %1344 = dma.done.wait (%p1522_p12), %s397_s17, 128  }
  0x53   : > { %1346 = vsyncadd (%p1522_p12), %s397_s17, 4294967168 }
  0x54   : > { %1348 = dma.done.wait (%p55_p1), [#allocation7], 512  }
  0x55   : > { %1350 = vsyncadd (%p55_p1), [#allocation7], 4294966784 }
  0x56   : > { %1352 = dma.done.wait (%p55_p1), [#allocation10], 1024  }
  0x57   : > { %1354 = vsyncadd (%p55_p1), [#allocation10], 4294966272 }
  0x58   : > { %1356 = dma.done.wait (%p55_p1), [#allocation13], 512  }
  0x59   : > { %1358 = vsyncadd (%p55_p1), [#allocation13], 4294966784  ;;  %v543_v0 = vld [vmem:[%s400_s25] sm:$0xff]  ;;  %s1389_s23 = smov 64   ;;  %v467_v3 = vld [vmem:[#allocation8 + $0x8] sm:$0xff]  ;;  %s1390_s22 = smov 96  }
  0x5a   : > { %v469_v1 = vld [vmem:[#allocation8 + $0x18] sm:$0xff]  ;;  %v468_v2 = vld [vmem:[#allocation8 + $0x10] sm:$0xff]  ;;  %545 = vrot.lane.b32.xlu0 %v543_v0, %s1389_s23  ;;  %v466_v4 = vld [vmem:[#allocation8] sm:$0xff]  ;;  %vm471_vm0 = vcmask 261120   ;;  %s1391_s28 = smov 32   ;;  %vm534_vm3 = vcmask 523520  }
  0x5b   : > { %561 = vmatpush.msra.mxu2 %v469_v1  ;;  %487 = vmatpush.msra.mxu0 %v469_v1  ;;  %v604_v26 = vld [vmem:[#allocation11 + $0x18] sm:$0xff]  ;;  %v603_v27 = vld [vmem:[#allocation11 + $0x10] sm:$0xff]  ;;  %v602_v30 = vld [vmem:[#allocation11 + $0x8] sm:$0xff]  ;;  %vm573_vm4 = vcmask 785920   ;;  %s973_s19 = sshll.u32 %s1466_s16, 3  ;;  %s458_s3 = scalar_lea.vmem [#allocation14], %s1585_s26 }
  0x5c   : > { %522 = vmatpush.msra.mxu1 %v469_v1  ;;  %622 = vmatpush.msra.mxu3 %v604_v26  ;;  %v600_v29 = vld [vmem:[#allocation9 + $0x18] sm:$0xff]  ;;  %v601_v31 = vld [vmem:[#allocation11] sm:$0xff]  ;;  %v599_v34 = vld [vmem:[#allocation9 + $0x10] sm:$0xff]  ;;  %s762_s27 = scalar_lea.hbm %s1715_s8, %s973_s19  ;;  %s764_s11 = sshll.u32 %s458_s3, 4  ;;  %s765_s11 = int_to_ptr.vmem [resolvable:$true] %s764_s11 }
  0x5d   : > { %562 = vmatpush.msra.mxu2 %v468_v2  ;;  %488 = vmatpush.msra.mxu0 %v468_v2  ;;  %v598_v35 = vld [vmem:[#allocation9 + $0x8] sm:$0xff]  ;;  %v597_v36 = vld [vmem:[#allocation9] sm:$0xff]  ;;  %v1079_v49 = vld [vmem:[%s1712_s5] ss:$0 sm:$0xff]  ;;  %s766_s20 = sshll.u32 %s762_s27, 4  ;;  %s767_s20 = int_to_ptr.hbm [resolvable:$true] %s766_s20 }
  0x5e   : > { %523 = vmatpush.msra.mxu1 %v468_v2  ;;  %623 = vmatpush.msra.mxu3 %v603_v27  ;;  %v596_v37 = vld [vmem:[%s390_s12] sm:$0xff]  ;;  %v681_v50 = vld [vmem:[#allocation12 + $0x18] sm:$0xff]  ;;  %v680_v53 = vld [vmem:[#allocation12 + $0x10] sm:$0xff]  ;;  %s747_s12 = scalar_lea.sflag [#allocation5], %s1582_s6  ;;  %s1281_s2 = sshra.s32 %s767_s20, 4  ;;  %s1282_s2 = int_to_ptr.hbm [resolvable:$true] %s1281_s2 }
  0x5f   : > { %563 = vmatpush.msra.mxu2 %v467_v3  ;;  %489 = vmatpush.msra.mxu0 %v467_v3  ;;  %v679_v55 = vld [vmem:[#allocation12 + $0x8] sm:$0xff]  ;;  %v678_v57 = vld [vmem:[#allocation12] sm:$0xff]  ;;  %s1283_s17 = scalar_lea.hbm %s1282_s2, 8  ;;  %p1288_p7 = scmp.lt.s32.totalorder %s1282_s2, %s1715_s8 }
  0x60   : > { %524 = vmatpush.msra.mxu1 %v467_v3  ;;  %624 = vmatpush.msra.mxu3 %v602_v30  ;;  %p1284_p1 = scmp.ne.s32.totalorder %s1282_s2, %s1283_s17 }
  0x61   : > { %564 = vmatpush.msra.mxu2 %v466_v4  ;;  %490 = vmatpush.msra.mxu0 %v466_v4 }
  0x62   : > { %506 = vrot.lane.b32.xlu0 %v543_v0, %s1390_s22  ;;  %525 = vmatpush.msra.mxu1 %v466_v4  ;;  %p1285_p3 = pnand %p1284_p1, %p1529_p4 }
  0x63   : > { %965 = vmatmul.msk.f32.vlgmr.msra.gmra.mxu0 %vm471_vm0, %v543_v0  ;;  %625 = vmatpush.msra.mxu3 %v601_v31 }
  0x64   : > { %645 = vmatpush.msrb.mxu0 %v600_v29  ;;  %701 = vmatpush.msrb.mxu1 %v681_v50  ;;  %p1286_p12 = pneg %p1285_p3 }
  0x66   : > { %646 = vmatpush.msrb.mxu0 %v599_v34  ;;  %702 = vmatpush.msrb.mxu1 %v680_v53 }
  0x68   : > { %647 = vmatpush.msrb.mxu0 %v598_v35  ;;  %703 = vmatpush.msrb.mxu1 %v679_v55 }
  0x6a   : > { %648 = vmatpush.msrb.mxu0 %v597_v36  ;;  %704 = vmatpush.msrb.mxu1 %v678_v57 }
  0x6b   : > { %969 = vmatmul.msk.f32.vlgmr.msrb.gmra.mxu0 %vm471_vm0, %v596_v37 }
  0xcc   : > { %v546_v5 = vpop.permute.xlu0 %545 }
  0xcd   : > { %967 = vmatmul.msk.f32.vlgmr.msra.gmra.mxu2 %vm471_vm0, %v546_v5 }
  0xd4   : > { %v507_v6 = vpop.permute.xlu0 %506 }
  0xd5   : > { %966 = vmatmul.msk.f32.vlgmr.msra.gmra.mxu1 %vm471_vm0, %v507_v6 }
  0xe0   : > { %v492_v7 = vpop.f32.mrf.mxu0 }
  0xe1   : > { %495 = vst.msk [vmem:[#allocation2] sm:$0xff] %vm471_vm0, %v492_v7  ;;  %v502_v9 = vmul.f32 %v492_v7, %v492_v7 }
  0xe8   : > { %v650_v48 = vpop.f32.mrf.mxu0 }
 0x150   : > { %v1617_v8 = vpop.f32.mrf.mxu2 }
 0x151   : > { %570 = vrot.lane.b32.xlu0 %v1617_v8, %s1389_s23  ;;  %v580_v12 = vmul.f32 %v1617_v8, %v1617_v8 }
 0x152   : > { %v527_v10 = vpop.f32.mrf.mxu1 }
 0x153   : > { %v541_v11 = vmul.f32 %v527_v10, %v527_v10  ;;  %536 = vrot.lane.b32.xlu2 %v527_v10, %s1390_s22 }
 0x155   : > { %v542_v13 = vadd.f32 %v541_v11, %v502_v9  ;;  %v1080_v9 = vld [vmem:[%s1714_s7] ss:$0 sm:$0xff] }
 0x157   : > { %v581_v14 = vadd.f32 %v580_v12, %v542_v13 }
 0x159   : > { %v583_v15 = vadd.f32 1e-08, %v581_v14 }
 0x15b   : > { %531 = vrot.lane.b32.xlu2 %v527_v10, %s1391_s28  ;;  %1081 = vrsqrt.f32 %v583_v15  ;;  %vm591_vm1 = vcmp.eq.f32.partialorder %v583_v15, inf  ;;  %v594_v23 = vand.u32 2147483648, %v583_v15  ;;  %vm593_vm2 = vcmp.eq.f32.partialorder %v583_v15, 0.0 }
 0x161   : > { %v1082_v16 = vpop.eup %1081 }
 0x162   : > { %v585_v17 = vmul.f32 %v1082_v16, %v583_v15 }
 0x164   : > { %v586_v18 = vmul.f32 %v1082_v16, %v585_v17 }
 0x166   : > { %v587_v19 = vmul.f32 0.5, %v586_v18 }
 0x168   : > { %v588_v20 = vsub.f32 1.5, %v587_v19 }
 0x16a   : > { %v589_v21 = vmul.f32 %v1082_v16, %v588_v20 }
 0x16c   : > { %v590_v22 = vmul.f32 %v589_v21, %v583_v15 }
 0x16e   : > { %v592_v24 = vsel %vm591_vm1, %v583_v15, %v590_v22 }
 0x16f   : > { %v595_v25 = vsel %vm593_vm2, %v594_v23, %v592_v24 }
 0x170   : > { %606 = vrot.lane.b32.xlu1 %v595_v25, %s1390_s22 }
 0x178   : > { %497 = vrot.lane.b32.xlu1 %v492_v7, %s1390_s22 }
 0x180   : > { %575 = vrot.lane.b32.xlu1 %v1617_v8, %s1390_s22 }
 0x1ad   : > { %v537_v28 = vpop.permute.xlu2 %536 }
 0x1ae   : > { %v539_v42 = vmul.f32 %v537_v28, %v527_v10 }
 0x1b5   : > { %v532_v32 = vpop.permute.xlu2 %531 }
 0x1b6   : > { %535 = vst.msk [vmem:[#allocation2] sm:$0xff] %vm534_vm3, %v532_v32 }
 0x1c3   : > { %v571_v33 = vpop.permute.xlu0 %570 }
 0x1c4   : > { %574 = vst.msk [vmem:[#allocation2] sm:$0xff] %vm573_vm4, %v571_v33 }
 0x1cb   : > { %v1634_v38 = vld [vmem:[#allocation2] sm:$0xff] }
 0x1cc   : > { %734 = vrot.lane.b32.xlu1 %v1634_v38, %s1391_s28  ;;  %723 = vrot.lane.b32.xlu0 %v1634_v38, %s1389_s23 }
 0x1e2   : > { %v607_v39 = vpop.permute.xlu1 %606 }
 0x1e3   : > { %968 = vmatmul.msk.f32.vlgmr.msra.gmra.mxu3 %vm471_vm0, %v607_v39 }
 0x1ea   : > { %v498_v40 = vpop.permute.xlu1 %497 }
 0x1eb   : > { %v500_v41 = vmul.f32 %v498_v40, %v492_v7 }
 0x1ed   : > { %v540_v44 = vadd.f32 %v539_v42, %v500_v41 }
 0x1f2   : > { %v576_v43 = vpop.permute.xlu1 %575 }
 0x1f3   : > { %v578_v45 = vmul.f32 %v576_v43, %v1617_v8 }
 0x1f5   : > { %v579_v46 = vadd.f32 %v578_v45, %v540_v44 }
 0x1f7   : > { %v582_v47 = vmul.f32 0.17677669, %v579_v46 }
 0x1f9   : > { %710 = vrot.lane.b32.xlu2 %v582_v47, %s1391_s28 }
 0x23e   : > { %v735_v11 = vpop.permute.xlu1 %734  ;;  %v724_v13 = vpop.permute.xlu0 %723 }
 0x253   : > { %v711_v14 = vpop.permute.xlu2 %710 }
 0x266   : > { %v627_v51 = vpop.f32.mrf.mxu3 }
 0x267   : > { %v651_v52 = vadd.f32 %v650_v48, %v627_v51 }
 0x269   : > { %v657_v54 = vadd.f32 %v1079_v49, %v651_v52 }
 0x26b   : > { %v658_v56 = vsub.f32 0.0, %v657_v54 }
 0x26d   : > { %v659_v58 = vmul.f32 1.442695, %v658_v56 }
 0x26f   : > { %1083 = vpow2.f32 %v659_v58 }
 0x275   : > { %v1084_v59 = vpop.eup %1083 }
 0x276   : > { %v661_v60 = vadd.f32 1.0, %v1084_v59 }
 0x278   : > { %1085 = vrcp.f32 %v661_v60  ;;  %v673_v0 = vand.u32 2147483648, %v661_v60  ;;  %v671_v2 = vand.u32 2147483647, %v661_v60  ;;  %vm667_vm6 = vweird.f32 %v661_v60 }
 0x27a   : > { %v674_v4 = vor.u32 1.1754944e-38, %v673_v0  ;;  %vm672_vm8 = vcmp.eq.f32.partialorder %v671_v2, 8.507059e+37 }
 0x27e   : > { %v1086_v61 = vpop.eup %1085 }
 0x27f   : > { %v663_v62 = vmul.f32 %v1086_v61, %v661_v60  ;;  %vm668_vm5 = vweird.f32 %v1086_v61 }
 0x280   : > { %vm669_vm7 = vmor %vm667_vm6, %vm668_vm5 }
 0x281   : > { %v664_v63 = vsub.f32 1.0, %v663_v62 }
 0x283   : > { %v665_v1 = vmul.f32 %v1086_v61, %v664_v63 }
 0x285   : > { %v666_v3 = vadd.f32 %v1086_v61, %v665_v1 }
 0x287   : > { %v670_v5 = vsel %vm669_vm7, %v1086_v61, %v666_v3 }
 0x288   : > { %v675_v6 = vsel %vm672_vm8, %v674_v4, %v670_v5 }
 0x289   : > { %v676_v7 = vmul.f32 %v675_v6, %v657_v54 }
 0x28b   : > { %v677_v8 = vmul.f32 1.6666666, %v676_v7 }
 0x28d   : > { %970 = vmatmul.msk.f32.vlgmr.msrb.gmra.mxu1 %vm471_vm0, %v677_v8 }
 0x30a   : > { %v706_v10 = vpop.f32.mrf.mxu1 }
 0x30b   : > { %v707_v12 = vadd.f32 %v1080_v9, %v706_v10 }
 0x30d   : > { %v713_v15 = vmul.f32 %v711_v14, %v707_v12  ;;  %v737_v16 = vmul.f32 %v735_v11, %v707_v12  ;;  %v726_v17 = vmul.f32 %v724_v13, %v707_v12 }
 0x30f   : > { %715 = vrot.lane.b32.xlu2 %v713_v15, %s1390_s22  ;;  %739 = vrot.lane.b32.xlu1 %v737_v16, %s1390_s22 }
 0x310   : > { %728 = vrot.lane.b32.xlu0 %v726_v17, %s1389_s23  ;;  %s1287_s23 = scalar_lea.hbm %s1715_s8, 16 }
 0x311   : > { %p1289_p9 = scmp.lt.s32.totalorder %s1287_s23, %s1283_s17 }
 0x313   : > { %p1290_p8 = por %p1289_p9, %p1288_p7 }
 0x315   : > { %p1291_p10 = pnand %p1290_p8, %p1286_p12 }
 0x369   : > { %v716_v18 = vpop.permute.xlu2 %715 }
 0x36a   : > { %v718_v19 = vadd.f32 %v716_v18, %v707_v12 }
 0x36c   : > { %v719_v20 = vmul.f32 0.70710677, %v718_v19 }
 0x36e   : > { %720 = vst.msk [vmem:[%s458_s3] sm:$0xff] %vm471_vm0, %v719_v20 }
 0x36f   : > { %1294 = shalt.err (!%p1291_p10)
}
 0x370   : > { %997 = dma.vmem_to_hbm [thread:$0]  (%p1529_p4), %s765_s11, 128, %s767_s20, %s747_s12   ;;  %v744_v23 = vmul.f32 %v1634_v38, %v707_v12 }
 0x371   : > { %s776_s21 = scalar_lea.hbm %s1716_s9, %s973_s19  ;;  %s465_s14 = scalar_lea.vmem [#allocation15], %s1585_s26 }
 0x372   : > { %s778_s24 = sshll.u32 %s465_s14, 4  ;;  %s780_s15 = sshll.u32 %s776_s21, 4  ;;  %s779_s24 = int_to_ptr.vmem [resolvable:$true] %s778_s24  ;;  %s781_s15 = int_to_ptr.hbm [resolvable:$true] %s780_s15 }
 0x373   : > { %s752_s27 = scalar_lea.sflag [#allocation16], %s1582_s6  ;;  %s1309_s3 = sshra.s32 %s781_s15, 4  ;;  %s1310_s3 = int_to_ptr.hbm [resolvable:$true] %s1309_s3 }
 0x374   : > { %s1311_s19 = scalar_lea.hbm %s1310_s3, 8  ;;  %s1315_s20 = scalar_lea.hbm %s1716_s9, 16 }
 0x375   : > { %p1312_p11 = scmp.ne.s32.totalorder %s1310_s3, %s1311_s19  ;;  %p1316_p0 = scmp.lt.s32.totalorder %s1310_s3, %s1716_s9 }
 0x376   : > { %p1317_p2 = scmp.lt.s32.totalorder %s1315_s20, %s1311_s19 }
 0x377   : > { %p1313_p5 = pnand %p1312_p11, %p1529_p4 }
 0x378   : > { %p1318_p1 = por %p1317_p2, %p1316_p0 }
 0x379   : > { %p1314_p13 = pneg %p1313_p5 }
 0x37b   : > { %p1319_p3 = pnand %p1318_p1, %p1314_p13 }
 0x381   : > { %v740_v21 = vpop.permute.xlu1 %739 }
 0x382   : > { %v729_v22 = vpop.permute.xlu0 %728 }
 0x383   : > { %731 = vst.msk [vmem:[%s465_s14] sm:$0xff] %vm471_vm0, %v729_v22 }
 0x384   : > { %742 = vst.msk [vmem:[%s465_s14] sm:$0xff] %vm534_vm3, %v740_v21 }
 0x385   : > { %745 = vst.msk [vmem:[%s465_s14] sm:$0xff] %vm573_vm4, %v744_v23 }
 0x386   : > { %1322 = shalt.err (!%p1319_p3)
}
 0x387   : > { %998 = dma.vmem_to_hbm [thread:$0]  (%p1529_p4), %s779_s24, 128, %s781_s15, %s752_s27  }
 0x388 PF: > { %s1740_s6 = sld [smem:[#allocation25_spill]]  ;;  %s792_s17 = sand.u32 1, %s1369_s30  }
 0x389   : > { %s793_s16 = scalar_lea.sflag [#allocation5], %s792_s17 }
 0x38e   : > { %p1741_p12 = scmp.ge.s32.totalorder %s1740_s6, 2 }
 0x390   : > { %p1022_p7 = pnand %p1741_p12, %p1533_p6 }
 0x392   : > { %p1023_p9 = pneg %p1022_p7 }
 0x394   : > { %1360 = dma.done.wait (%p1023_p9), %s793_s16, 128  }
 0x395   : > { %1362 = vsyncadd (%p1023_p9), %s793_s16, 4294967168  ;;  %s803_s25 = scalar_lea.sflag [#allocation16], %s792_s17 }
 0x396   : > { %1364 = dma.done.wait (%p1023_p9), %s803_s25, 128  }
 0x397   : > { %1366 = vsyncadd (%p1023_p9), %s803_s25, 4294967168  ;;  %s1742_s12 = sld [smem:[#allocation26_spill]]  ;;  %s1745_s30 = smov %s1373_s10 }
 0x398   : > { %s1743_s23 = sld [smem:[#allocation24_spill]] }
 0x399   : > { %s1744_s11 = sld [smem:[#allocation27_spill]] }
 0x39d   : > { %p31_p4 = scmp.ge.s32.totalorder %s1742_s12, 4  }
 0x39e   : > { %s1746_s10 = smov %s1743_s23 }
 0x39f   :  { %33 = sbr.rel (!%p31_p4) target bundleno = 16 (0x10), region = 143 }
 0x3a4   :  { %809 = vsyncpa [#allocation4], 1 }
 0x3a5   :  { %811 = vsyncpa [#allocation4 + $0x1], 1 }
 0x3a6   :  { %812 = vsyncpa [#allocation7], 1 }
 0x3a7   :  { %814 = vsyncpa [#allocation7 + $0x1], 1 }
 0x3a8   :  { %815 = vsyncpa [#allocation10], 1 }
 0x3a9   :  { %816 = vsyncpa [#allocation13], 1 }
 0x3aa   :  { %817 = vsyncpa [#allocation5], 1 }
 0x3ab   :  { %819 = vsyncpa [#allocation5 + $0x1], 1 }
 0x3ac   :  { %820 = vsyncpa [#allocation16], 1 }
 0x3ad   :  { %822 = vsyncpa [#allocation16 + $0x1], 1 }

// kernel: tpu_custom_call.1
= control target key start
LH: loop header
LB: loop body
LE: loop exit
PB: predicated region body
PF: predicated region fallthrough
CT: control target
= control target key end

     0   :  { %s1707_s0 = inlined_call_operand.hbm [shape: f32[16,32], index: 0, kind: input, shape index: {}]   ;;  %s1708_s1 = inlined_call_operand.hbm [shape: f32[16,96], index: 1, kind: input, shape index: {}]   ;;  %s1709_s2 = inlined_call_operand.hbm [shape: f32[32,64], index: 2, kind: input, shape index: {}]   ;;  %s1710_s3 = inlined_call_operand.hbm [shape: f32[32,32], index: 3, kind: input, shape index: {}]   ;;  %s1711_s4 = inlined_call_operand.hbm [shape: f32[32,32], index: 4, kind: input, shape index: {}]   ;;  %s1712_s5 = inlined_call_operand.vmem [shape: f32[1,32], index: 5, kind: input, shape index: {}]   ;;  %s1713_s6 = inlined_call_operand.hbm [shape: f32[32,96], index: 6, kind: input, shape index: {}]   ;;  %s1714_s7 = inlined_call_operand.vmem [shape: f32[1,96], index: 7, kind: input, shape index: {}]   ;;  %s1715_s8 = inlined_call_operand.hbm [shape: f32[16,32], index: 8, kind: output, shape index: {0}]   ;;  %s1716_s9 = inlined_call_operand.hbm [shape: f32[16,96], index: 9, kind: output, shape index: {1}]  }
   0x1   :  { %1721 = sst [smem:[#allocation28_spill]] %s1709_s2 }
   0x2   :  { %1722 = sst [smem:[#allocation29_spill]] %s1710_s3 }
   0x3   :  { %1723 = sst [smem:[#allocation30_spill]] %s1711_s4 }
   0x4   :  { %1724 = sst [smem:[#allocation31_spill]] %s1713_s6 }
   0x5   :  { %15 = vsyncpa [#allocation4], 0 }
   0x6   :  { %17 = vsyncpa [#allocation4 + $0x1], 0 }
   0x7   :  { %18 = vsyncpa [#allocation7], 0 }
   0x8   :  { %20 = vsyncpa [#allocation7 + $0x1], 0 }
   0x9   :  { %21 = vsyncpa [#allocation10], 0 }
   0xa   :  { %22 = vsyncpa [#allocation13], 0 }
   0xb   :  { %23 = vsyncpa [#allocation5], 0 }
   0xc   :  { %25 = vsyncpa [#allocation5 + $0x1], 0 }
   0xd   :  { %26 = vsyncpa [#allocation16], 0 }
   0xe   :  { %28 = vsyncpa [#allocation16 + $0x1], 0  ;;  %s1442_s30 = smov 0   ;;  %s1444_s10 = smov 0  }
   0xf   :  { %s1446_s11 = smov 0   ;;  %s1448_s12 = smov 0  }
  0x10 LB: > { %1725 = sst [smem:[#allocation24_spill]] %s1377_s11  ;;  %s1466_s16 = sadd.s32 4294967295, %s1381_s12   ;;  %s1381_s12 = sphi %s1448_s12, %s1742_s12   ;;  %s1377_s11 = sphi %s1446_s11, %s1744_s11   ;;  %s1373_s10 = sphi %s1444_s10, %s1746_s10   ;;  %s1369_s30 = sphi %s1442_s30, %s1745_s30  }
  0x11   : > { %1726 = sst [smem:[#allocation25_spill]] %s1381_s12  ;;  %p946_p0 = scmp.ge.s32.totalorder %s1381_s12, 1 }
  0x12   : > { %s1727_s2 = sld [smem:[#allocation28_spill]]  ;;  %p55_p1 = scmp.eq.s32.totalorder %s1466_s16, 0 }
  0x13   : > { %p269_p2 = scmp.lt.s32.totalorder %s1381_s12, 3  ;;  %s1383_s18 = smov [#allocation8]  }
  0x14   : > { %s282_s19 = sshll.u32 %s1383_s18, 4  ;;  %s1729_s3 = sld [smem:[#allocation29_spill]]  ;;  %s283_s19 = int_to_ptr.vmem [resolvable:$true] %s282_s19 }
  0x15   : > { %p1471_p3 = pnand %p946_p0, %p269_p2  ;;  %s1731_s4 = sld [smem:[#allocation30_spill]] }
  0x16   : > { %s1384_s27 = smov [#allocation9]   ;;  %s1385_s29 = smov 128  }
  0x17   : > { %p1001_p4 = pneg %p1471_p3  ;;  %s296_s28 = sshll.u32 %s1384_s27, 4  ;;  %s297_s28 = int_to_ptr.vmem [resolvable:$true] %s296_s28 }
  0x18   : > { %s280_s15 = sshll.u32 %s1727_s2, 4  ;;  %s1386_s13 = smov 8   ;;  %s281_s15 = int_to_ptr.hbm [resolvable:$true] %s280_s15 }
  0x19   : > { %p1483_p6 = pnand %p1001_p4, %p55_p1  ;;  %s1732_s6 = sld [smem:[#allocation31_spill]] }
  0x1a   : > { %s294_s22 = sshll.u32 %s1729_s3, 4  ;;  %s1387_s21 = smov [#allocation11]   ;;  %s295_s22 = int_to_ptr.hbm [resolvable:$true] %s294_s22 }
  0x1b   : > { %s308_s26 = sshll.u32 %s1731_s4, 4  ;;  %s310_s24 = sshll.u32 %s1387_s21, 4  ;;  %s309_s26 = int_to_ptr.hbm [resolvable:$true] %s308_s26  ;;  %s311_s24 = int_to_ptr.vmem [resolvable:$true] %s310_s24 }
  0x1c   : > { %1004 = dma.hbm_to_vmem [thread:$0]  (!%p1483_p6), %s281_s15, 512, %s283_s19, [#allocation7], %s1385_s29, %s1385_s29, %s1386_s13  }
  0x1d   : > { %1007 = dma.hbm_to_vmem [thread:$0]  (!%p1483_p6), %s295_s22, 512, %s297_s28, [#allocation10], %s1385_s29, %s1385_s29, %s1386_s13  }
  0x1e   : > { %1010 = dma.hbm_to_vmem [thread:$0]  (!%p1483_p6), %s309_s26, 512, %s311_s24, [#allocation10], %s1385_s29, %s1385_s29, %s1386_s13  }
  0x1f   : > { %s325_s20 = sshll.u32 %s1732_s6, 4  ;;  %s1388_s15 = smov [#allocation12]   ;;  %s326_s20 = int_to_ptr.hbm [resolvable:$true] %s325_s20 }
  0x20   : > { %s327_s19 = sshll.u32 %s1388_s15, 4  ;;  %s945_s22 = sadd.s32 4294967294, %s1381_s12   ;;  %s328_s19 = int_to_ptr.vmem [resolvable:$true] %s327_s19 }
  0x21   : > { %1013 = dma.hbm_to_vmem [thread:$0]  (!%p1483_p6), %s326_s20, 512, %s328_s19, [#allocation13], %s1385_s29, %s1385_s29, %s1386_s13  }
  0x22   : > { %s1503_s25 = sadd.s32 1, %s1381_s12   ;;  %s41_s28 = sadd.s32 1, %s1377_s11 }
  0x23   : > { %1733 = sst [smem:[#allocation26_spill]] %s1503_s25  ;;  %s38_s27 = ssub.s32 %s1381_s12, %s1503_s25 }
  0x24   : > { %p39_p7 = scmp.eq.s32.totalorder %s38_s27, 0  ;;  %p48_p8 = scmp.ne.s32.totalorder %s1377_s11, %s1373_s10 }
  0x25   : > { %p49_p9 = scmp.eq.s32.totalorder %s1381_s12, 0  ;;  %p54_p10 = scmp.ne.s32.totalorder %s1373_s10, %s1369_s30 }
  0x26   : > { %s1514_s26 = scalar_select %p39_p7, %s1377_s11, %s41_s28  }
  0x27   : > { %p1516_p11 = por %p49_p9, %p48_p8  ;;  %p1522_p12 = por %p55_p1, %p54_p10 }
  0x28   : > { %1734 = sst [smem:[#allocation27_spill]] %s1514_s26  ;;  %p230_p13 = scmp.eq.s32.totalorder %s1466_s16, 1 }
  0x29   : > { %p236_p0 = scmp.eq.s32.totalorder %s945_s22, 1  ;;  %p1032_p2 = scmp.lt.s32.totalorder %s1381_s12, 2 }
  0x2a   : > { %s344_s29 = sand.u32 1, %s1377_s11   ;;  %p1529_p4 = por %p230_p13, %p48_p8 }
  0x2b   : > { %p1533_p6 = por %p236_p0, %p54_p10  ;;  %s1537_s20 = sshll.u32 %s344_s29, 3 }
  0x2c   : > { %s953_s21 = sshll.u32 %s1381_s12, 3  ;;  %s348_s27 = scalar_lea.vmem [#allocation3], %s1537_s20 }
  0x2d   : > { %s352_s19 = scalar_lea.hbm %s1707_s0, %s953_s21  ;;  %s356_s22 = sshll.u32 %s348_s27, 4  ;;  %s357_s22 = int_to_ptr.vmem [resolvable:$true] %s356_s22 }
  0x2e   : > { %s354_s28 = sshll.u32 %s352_s19, 4  ;;  %p1546_p7 = pnand %p1032_p2, %p1516_p11  ;;  %s355_s28 = int_to_ptr.hbm [resolvable:$true] %s354_s28 }
  0x2f   : > { %s371_s6 = scalar_lea.hbm %s1708_s1, %s953_s21  ;;  %s363_s26 = sand.u32 1, %s1381_s12  }
  0x30   : > { %s345_s11 = scalar_lea.sflag [#allocation4], %s344_s29  ;;  %s1207_s24 = sshra.s32 %s355_s28, 4  ;;  %s1208_s24 = int_to_ptr.hbm [resolvable:$true] %s1207_s24 }
  0x31   : > { %s1209_s15 = scalar_lea.hbm %s1208_s24, 8  ;;  %p1211_p9 = pneg %p1546_p7 }
  0x32   : > { %p1210_p8 = scmp.ne.s32.totalorder %s1208_s24, %s1209_s15  ;;  %s1214_s27 = scalar_lea.hbm %s1707_s0, 16 }
  0x33   : > { %p1215_p13 = scmp.lt.s32.totalorder %s1208_s24, %s1707_s0  ;;  %p1216_p0 = scmp.lt.s32.totalorder %s1214_s27, %s1209_s15 }
  0x34   : > { %p1212_p10 = pnand %p1211_p9, %p1210_p8 }
  0x35   : > { %p1217_p2 = por %p1216_p0, %p1215_p13 }
  0x36   : > { %p1213_p11 = pneg %p1212_p10 }
  0x38   : > { %p1218_p5 = pnand %p1217_p2, %p1213_p11 }
  0x3a   : > { %1221 = shalt.err (!%p1218_p5)
}
  0x3b   : > { %1017 = dma.hbm_to_vmem [thread:$0]  (!%p1546_p7), %s355_s28, 128, %s357_s22, %s345_s11  }
  0x3c   : > { %s373_s29 = sshll.u32 %s371_s6, 4  ;;  %s367_s21 = scalar_lea.vmem [#allocation6], %s1537_s20  ;;  %s374_s29 = int_to_ptr.hbm [resolvable:$true] %s373_s29 }
  0x3d   : > { %s375_s25 = sshll.u32 %s367_s21, 4  ;;  %s364_s14 = scalar_lea.sflag [#allocation7], %s363_s26  ;;  %s376_s25 = int_to_ptr.vmem [resolvable:$true] %s375_s25 }
  0x3e   : > { %s1237_s19 = sshra.s32 %s374_s29, 4  ;;  %s1244_s27 = scalar_lea.hbm %s1708_s1, 16  ;;  %s1238_s19 = int_to_ptr.hbm [resolvable:$true] %s1237_s19 }
  0x3f   : > { %s1239_s12 = scalar_lea.hbm %s1238_s19, 8  ;;  %p1245_p5 = scmp.lt.s32.totalorder %s1238_s19, %s1708_s1 }
  0x40   : > { %p1240_p8 = scmp.ne.s32.totalorder %s1238_s19, %s1239_s12  ;;  %p1246_p13 = scmp.lt.s32.totalorder %s1244_s27, %s1239_s12 }
  0x42   : > { %p1242_p10 = pnand %p1240_p8, %p1211_p9  ;;  %p1247_p0 = por %p1246_p13, %p1245_p5 }
  0x44   : > { %p1243_p11 = pneg %p1242_p10 }
  0x46   : > { %p1248_p2 = pnand %p1247_p0, %p1243_p11 }
  0x48   : > { %1251 = shalt.err (!%p1248_p2)
}
  0x49   : > { %1020 = dma.hbm_to_vmem [thread:$0]  (!%p1546_p7), %s374_s29, 128, %s376_s25, %s364_s14  }
  0x4a   : > { %384 = sbr.rel (%p1471_p3) target bundleno = 904 (0x388), region = 52  ;;  %s1582_s6 = sand.u32 (!%p1471_p3), 1, %s1373_s10  }
  0x4b   : > { %s1585_s26 = sshll.u32 (!%p1471_p3), %s1582_s6, 3  ;;  %s387_s20 = scalar_lea.sflag (!%p1471_p3), [#allocation4], %s1582_s6 }
  0x4c   : > { %s390_s12 = scalar_lea.vmem (!%p1471_p3), [#allocation3], %s1585_s26 }
  0x4f   : > { %1340 = dma.done.wait (%p1522_p12), %s387_s20, 128  }
  0x50   : > { %1342 = vsyncadd (%p1522_p12), %s387_s20, 4294967168  ;;  %s396_s2 = sand.u32 1, %s1466_s16   ;;  %s400_s25 = scalar_lea.vmem [#allocation6], %s1585_s26 }
  0x51   : > { %s397_s17 = scalar_lea.sflag [#allocation7], %s396_s2 }
  0x52   : > { %1344 = dma.done.wait (%p1522_p12), %s397_s17, 128  }
  0x53   : > { %1346 = vsyncadd (%p1522_p12), %s397_s17, 4294967168 }
  0x54   : > { %1348 = dma.done.wait (%p55_p1), [#allocation7], 512  }
  0x55   : > { %1350 = vsyncadd (%p55_p1), [#allocation7], 4294966784 }
  0x56   : > { %1352 = dma.done.wait (%p55_p1), [#allocation10], 1024  }
  0x57   : > { %1354 = vsyncadd (%p55_p1), [#allocation10], 4294966272 }
  0x58   : > { %1356 = dma.done.wait (%p55_p1), [#allocation13], 512  }
  0x59   : > { %1358 = vsyncadd (%p55_p1), [#allocation13], 4294966784  ;;  %v543_v0 = vld [vmem:[%s400_s25] sm:$0xff]  ;;  %s1389_s23 = smov 64   ;;  %v467_v3 = vld [vmem:[#allocation8 + $0x8] sm:$0xff]  ;;  %s1390_s22 = smov 96  }
  0x5a   : > { %v469_v1 = vld [vmem:[#allocation8 + $0x18] sm:$0xff]  ;;  %v468_v2 = vld [vmem:[#allocation8 + $0x10] sm:$0xff]  ;;  %545 = vrot.lane.b32.xlu0 %v543_v0, %s1389_s23  ;;  %v466_v4 = vld [vmem:[#allocation8] sm:$0xff]  ;;  %vm471_vm0 = vcmask 261120   ;;  %s1391_s28 = smov 32   ;;  %vm534_vm3 = vcmask 523520  }
  0x5b   : > { %561 = vmatpush.msra.mxu2 %v469_v1  ;;  %487 = vmatpush.msra.mxu0 %v469_v1  ;;  %v604_v26 = vld [vmem:[#allocation11 + $0x18] sm:$0xff]  ;;  %v603_v27 = vld [vmem:[#allocation11 + $0x10] sm:$0xff]  ;;  %v602_v30 = vld [vmem:[#allocation11 + $0x8] sm:$0xff]  ;;  %vm573_vm4 = vcmask 785920   ;;  %s973_s19 = sshll.u32 %s1466_s16, 3  ;;  %s458_s3 = scalar_lea.vmem [#allocation14], %s1585_s26 }
  0x5c   : > { %522 = vmatpush.msra.mxu1 %v469_v1  ;;  %622 = vmatpush.msra.mxu3 %v604_v26  ;;  %v600_v29 = vld [vmem:[#allocation9 + $0x18] sm:$0xff]  ;;  %v601_v31 = vld [vmem:[#allocation11] sm:$0xff]  ;;  %v599_v34 = vld [vmem:[#allocation9 + $0x10] sm:$0xff]  ;;  %s762_s27 = scalar_lea.hbm %s1715_s8, %s973_s19  ;;  %s764_s11 = sshll.u32 %s458_s3, 4  ;;  %s765_s11 = int_to_ptr.vmem [resolvable:$true] %s764_s11 }
  0x5d   : > { %562 = vmatpush.msra.mxu2 %v468_v2  ;;  %488 = vmatpush.msra.mxu0 %v468_v2  ;;  %v598_v35 = vld [vmem:[#allocation9 + $0x8] sm:$0xff]  ;;  %v597_v36 = vld [vmem:[#allocation9] sm:$0xff]  ;;  %v1079_v49 = vld [vmem:[%s1712_s5] ss:$0 sm:$0xff]  ;;  %s766_s20 = sshll.u32 %s762_s27, 4  ;;  %s767_s20 = int_to_ptr.hbm [resolvable:$true] %s766_s20 }
  0x5e   : > { %523 = vmatpush.msra.mxu1 %v468_v2  ;;  %623 = vmatpush.msra.mxu3 %v603_v27  ;;  %v596_v37 = vld [vmem:[%s390_s12] sm:$0xff]  ;;  %v681_v50 = vld [vmem:[#allocation12 + $0x18] sm:$0xff]  ;;  %v680_v53 = vld [vmem:[#allocation12 + $0x10] sm:$0xff]  ;;  %s747_s12 = scalar_lea.sflag [#allocation5], %s1582_s6  ;;  %s1281_s2 = sshra.s32 %s767_s20, 4  ;;  %s1282_s2 = int_to_ptr.hbm [resolvable:$true] %s1281_s2 }
  0x5f   : > { %563 = vmatpush.msra.mxu2 %v467_v3  ;;  %489 = vmatpush.msra.mxu0 %v467_v3  ;;  %v679_v55 = vld [vmem:[#allocation12 + $0x8] sm:$0xff]  ;;  %v678_v57 = vld [vmem:[#allocation12] sm:$0xff]  ;;  %s1283_s17 = scalar_lea.hbm %s1282_s2, 8  ;;  %p1288_p7 = scmp.lt.s32.totalorder %s1282_s2, %s1715_s8 }
  0x60   : > { %524 = vmatpush.msra.mxu1 %v467_v3  ;;  %624 = vmatpush.msra.mxu3 %v602_v30  ;;  %p1284_p1 = scmp.ne.s32.totalorder %s1282_s2, %s1283_s17 }
  0x61   : > { %564 = vmatpush.msra.mxu2 %v466_v4  ;;  %490 = vmatpush.msra.mxu0 %v466_v4 }
  0x62   : > { %506 = vrot.lane.b32.xlu0 %v543_v0, %s1390_s22  ;;  %525 = vmatpush.msra.mxu1 %v466_v4  ;;  %p1285_p3 = pnand %p1284_p1, %p1529_p4 }
  0x63   : > { %965 = vmatmul.msk.f32.vlgmr.msra.gmra.mxu0 %vm471_vm0, %v543_v0  ;;  %625 = vmatpush.msra.mxu3 %v601_v31 }
  0x64   : > { %645 = vmatpush.msrb.mxu0 %v600_v29  ;;  %701 = vmatpush.msrb.mxu1 %v681_v50  ;;  %p1286_p12 = pneg %p1285_p3 }
  0x66   : > { %646 = vmatpush.msrb.mxu0 %v599_v34  ;;  %702 = vmatpush.msrb.mxu1 %v680_v53 }
  0x68   : > { %647 = vmatpush.msrb.mxu0 %v598_v35  ;;  %703 = vmatpush.msrb.mxu1 %v679_v55 }
  0x6a   : > { %648 = vmatpush.msrb.mxu0 %v597_v36  ;;  %704 = vmatpush.msrb.mxu1 %v678_v57 }
  0x6b   : > { %969 = vmatmul.msk.f32.vlgmr.msrb.gmra.mxu0 %vm471_vm0, %v596_v37 }
  0xcc   : > { %v546_v5 = vpop.permute.xlu0 %545 }
  0xcd   : > { %967 = vmatmul.msk.f32.vlgmr.msra.gmra.mxu2 %vm471_vm0, %v546_v5 }
  0xd4   : > { %v507_v6 = vpop.permute.xlu0 %506 }
  0xd5   : > { %966 = vmatmul.msk.f32.vlgmr.msra.gmra.mxu1 %vm471_vm0, %v507_v6 }
  0xe0   : > { %v492_v7 = vpop.f32.mrf.mxu0 }
  0xe1   : > { %495 = vst.msk [vmem:[#allocation2] sm:$0xff] %vm471_vm0, %v492_v7  ;;  %v502_v9 = vmul.f32 %v492_v7, %v492_v7 }
  0xe8   : > { %v650_v48 = vpop.f32.mrf.mxu0 }
 0x150   : > { %v1617_v8 = vpop.f32.mrf.mxu2 }
 0x151   : > { %570 = vrot.lane.b32.xlu0 %v1617_v8, %s1389_s23  ;;  %v580_v12 = vmul.f32 %v1617_v8, %v1617_v8 }
 0x152   : > { %v527_v10 = vpop.f32.mrf.mxu1 }
 0x153   : > { %v541_v11 = vmul.f32 %v527_v10, %v527_v10  ;;  %536 = vrot.lane.b32.xlu2 %v527_v10, %s1390_s22 }
 0x155   : > { %v542_v13 = vadd.f32 %v541_v11, %v502_v9  ;;  %v1080_v9 = vld [vmem:[%s1714_s7] ss:$0 sm:$0xff] }
 0x157   : > { %v581_v14 = vadd.f32 %v580_v12, %v542_v13 }
 0x159   : > { %v583_v15 = vadd.f32 1e-08, %v581_v14 }
 0x15b   : > { %531 = vrot.lane.b32.xlu2 %v527_v10, %s1391_s28  ;;  %1081 = vrsqrt.f32 %v583_v15  ;;  %vm591_vm1 = vcmp.eq.f32.partialorder %v583_v15, inf  ;;  %v594_v23 = vand.u32 2147483648, %v583_v15  ;;  %vm593_vm2 = vcmp.eq.f32.partialorder %v583_v15, 0.0 }
 0x161   : > { %v1082_v16 = vpop.eup %1081 }
 0x162   : > { %v585_v17 = vmul.f32 %v1082_v16, %v583_v15 }
 0x164   : > { %v586_v18 = vmul.f32 %v1082_v16, %v585_v17 }
 0x166   : > { %v587_v19 = vmul.f32 0.5, %v586_v18 }
 0x168   : > { %v588_v20 = vsub.f32 1.5, %v587_v19 }
 0x16a   : > { %v589_v21 = vmul.f32 %v1082_v16, %v588_v20 }
 0x16c   : > { %v590_v22 = vmul.f32 %v589_v21, %v583_v15 }
 0x16e   : > { %v592_v24 = vsel %vm591_vm1, %v583_v15, %v590_v22 }
 0x16f   : > { %v595_v25 = vsel %vm593_vm2, %v594_v23, %v592_v24 }
 0x170   : > { %606 = vrot.lane.b32.xlu1 %v595_v25, %s1390_s22 }
 0x178   : > { %497 = vrot.lane.b32.xlu1 %v492_v7, %s1390_s22 }
 0x180   : > { %575 = vrot.lane.b32.xlu1 %v1617_v8, %s1390_s22 }
 0x1ad   : > { %v537_v28 = vpop.permute.xlu2 %536 }
 0x1ae   : > { %v539_v42 = vmul.f32 %v537_v28, %v527_v10 }
 0x1b5   : > { %v532_v32 = vpop.permute.xlu2 %531 }
 0x1b6   : > { %535 = vst.msk [vmem:[#allocation2] sm:$0xff] %vm534_vm3, %v532_v32 }
 0x1c3   : > { %v571_v33 = vpop.permute.xlu0 %570 }
 0x1c4   : > { %574 = vst.msk [vmem:[#allocation2] sm:$0xff] %vm573_vm4, %v571_v33 }
 0x1cb   : > { %v1634_v38 = vld [vmem:[#allocation2] sm:$0xff] }
 0x1cc   : > { %734 = vrot.lane.b32.xlu1 %v1634_v38, %s1391_s28  ;;  %723 = vrot.lane.b32.xlu0 %v1634_v38, %s1389_s23 }
 0x1e2   : > { %v607_v39 = vpop.permute.xlu1 %606 }
 0x1e3   : > { %968 = vmatmul.msk.f32.vlgmr.msra.gmra.mxu3 %vm471_vm0, %v607_v39 }
 0x1ea   : > { %v498_v40 = vpop.permute.xlu1 %497 }
 0x1eb   : > { %v500_v41 = vmul.f32 %v498_v40, %v492_v7 }
 0x1ed   : > { %v540_v44 = vadd.f32 %v539_v42, %v500_v41 }
 0x1f2   : > { %v576_v43 = vpop.permute.xlu1 %575 }
 0x1f3   : > { %v578_v45 = vmul.f32 %v576_v43, %v1617_v8 }
 0x1f5   : > { %v579_v46 = vadd.f32 %v578_v45, %v540_v44 }
 0x1f7   : > { %v582_v47 = vmul.f32 0.17677669, %v579_v46 }
 0x1f9   : > { %710 = vrot.lane.b32.xlu2 %v582_v47, %s1391_s28 }
 0x23e   : > { %v735_v11 = vpop.permute.xlu1 %734  ;;  %v724_v13 = vpop.permute.xlu0 %723 }
 0x253   : > { %v711_v14 = vpop.permute.xlu2 %710 }
 0x266   : > { %v627_v51 = vpop.f32.mrf.mxu3 }
 0x267   : > { %v651_v52 = vadd.f32 %v650_v48, %v627_v51 }
 0x269   : > { %v657_v54 = vadd.f32 %v1079_v49, %v651_v52 }
 0x26b   : > { %v658_v56 = vsub.f32 0.0, %v657_v54 }
 0x26d   : > { %v659_v58 = vmul.f32 1.442695, %v658_v56 }
 0x26f   : > { %1083 = vpow2.f32 %v659_v58 }
 0x275   : > { %v1084_v59 = vpop.eup %1083 }
 0x276   : > { %v661_v60 = vadd.f32 1.0, %v1084_v59 }
 0x278   : > { %1085 = vrcp.f32 %v661_v60  ;;  %v673_v0 = vand.u32 2147483648, %v661_v60  ;;  %v671_v2 = vand.u32 2147483647, %v661_v60  ;;  %vm667_vm6 = vweird.f32 %v661_v60 }
 0x27a   : > { %v674_v4 = vor.u32 1.1754944e-38, %v673_v0  ;;  %vm672_vm8 = vcmp.eq.f32.partialorder %v671_v2, 8.507059e+37 }
 0x27e   : > { %v1086_v61 = vpop.eup %1085 }
 0x27f   : > { %v663_v62 = vmul.f32 %v1086_v61, %v661_v60  ;;  %vm668_vm5 = vweird.f32 %v1086_v61 }
 0x280   : > { %vm669_vm7 = vmor %vm667_vm6, %vm668_vm5 }
 0x281   : > { %v664_v63 = vsub.f32 1.0, %v663_v62 }
 0x283   : > { %v665_v1 = vmul.f32 %v1086_v61, %v664_v63 }
 0x285   : > { %v666_v3 = vadd.f32 %v1086_v61, %v665_v1 }
 0x287   : > { %v670_v5 = vsel %vm669_vm7, %v1086_v61, %v666_v3 }
 0x288   : > { %v675_v6 = vsel %vm672_vm8, %v674_v4, %v670_v5 }
 0x289   : > { %v676_v7 = vmul.f32 %v675_v6, %v657_v54 }
 0x28b   : > { %v677_v8 = vmul.f32 1.6666666, %v676_v7 }
 0x28d   : > { %970 = vmatmul.msk.f32.vlgmr.msrb.gmra.mxu1 %vm471_vm0, %v677_v8 }
 0x30a   : > { %v706_v10 = vpop.f32.mrf.mxu1 }
 0x30b   : > { %v707_v12 = vadd.f32 %v1080_v9, %v706_v10 }
 0x30d   : > { %v713_v15 = vmul.f32 %v711_v14, %v707_v12  ;;  %v737_v16 = vmul.f32 %v735_v11, %v707_v12  ;;  %v726_v17 = vmul.f32 %v724_v13, %v707_v12 }
 0x30f   : > { %715 = vrot.lane.b32.xlu2 %v713_v15, %s1390_s22  ;;  %739 = vrot.lane.b32.xlu1 %v737_v16, %s1390_s22 }
 0x310   : > { %728 = vrot.lane.b32.xlu0 %v726_v17, %s1389_s23  ;;  %s1287_s23 = scalar_lea.hbm %s1715_s8, 16 }
 0x311   : > { %p1289_p9 = scmp.lt.s32.totalorder %s1287_s23, %s1283_s17 }
 0x313   : > { %p1290_p8 = por %p1289_p9, %p1288_p7 }
 0x315   : > { %p1291_p10 = pnand %p1290_p8, %p1286_p12 }
 0x369   : > { %v716_v18 = vpop.permute.xlu2 %715 }
 0x36a   : > { %v718_v19 = vadd.f32 %v716_v18, %v707_v12 }
 0x36c   : > { %v719_v20 = vmul.f32 0.70710677, %v718_v19 }
 0x36e   : > { %720 = vst.msk [vmem:[%s458_s3] sm:$0xff] %vm471_vm0, %v719_v20 }
 0x36f   : > { %1294 = shalt.err (!%p1291_p10)
}
 0x370   : > { %997 = dma.vmem_to_hbm [thread:$0]  (%p1529_p4), %s765_s11, 128, %s767_s20, %s747_s12   ;;  %v744_v23 = vmul.f32 %v1634_v38, %v707_v12 }
 0x371   : > { %s776_s21 = scalar_lea.hbm %s1716_s9, %s973_s19  ;;  %s465_s14 = scalar_lea.vmem [#allocation15], %s1585_s26 }
 0x372   : > { %s778_s24 = sshll.u32 %s465_s14, 4  ;;  %s780_s15 = sshll.u32 %s776_s21, 4  ;;  %s779_s24 = int_to_ptr.vmem [resolvable:$true] %s778_s24  ;;  %s781_s15 = int_to_ptr.hbm [resolvable:$true] %s780_s15 }
 0x373   : > { %s752_s27 = scalar_lea.sflag [#allocation16], %s1582_s6  ;;  %s1309_s3 = sshra.s32 %s781_s15, 4  ;;  %s1310_s3 = int_to_ptr.hbm [resolvable:$true] %s1309_s3 }
 0x374   : > { %s1311_s19 = scalar_lea.hbm %s1310_s3, 8  ;;  %s1315_s20 = scalar_lea.hbm %s1716_s9, 16 }
 0x375   : > { %p1312_p11 = scmp.ne.s32.totalorder %s1310_s3, %s1311_s19  ;;  %p1316_p0 = scmp.lt.s32.totalorder %s1310_s3, %s1716_s9 }
 0x376   : > { %p1317_p2 = scmp.lt.s32.totalorder %s1315_s20, %s1311_s19 }
 0x377   : > { %p1313_p5 = pnand %p1312_p11, %p1529_p4 }
 0x378   : > { %p1318_p1 = por %p1317_p2, %p1316_p0 }
 0x379   : > { %p1314_p13 = pneg %p1313_p5 }
 0x37b   : > { %p1319_p3 = pnand %p1318_p1, %p1314_p13 }
 0x381   : > { %v740_v21 = vpop.permute.xlu1 %739 }
 0x382   : > { %v729_v22 = vpop.permute.xlu0 %728 }
 0x383   : > { %731 = vst.msk [vmem:[%s465_s14] sm:$0xff] %vm471_vm0, %v729_v22 }
 0x384   : > { %742 = vst.msk [vmem:[%s465_s14] sm:$0xff] %vm534_vm3, %v740_v21 }
 0x385   : > { %745 = vst.msk [vmem:[%s465_s14] sm:$0xff] %vm573_vm4, %v744_v23 }
 0x386   : > { %1322 = shalt.err (!%p1319_p3)
}
 0x387   : > { %998 = dma.vmem_to_hbm [thread:$0]  (%p1529_p4), %s779_s24, 128, %s781_s15, %s752_s27  }
 0x388 PF: > { %s1740_s6 = sld [smem:[#allocation25_spill]]  ;;  %s792_s17 = sand.u32 1, %s1369_s30  }
 0x389   : > { %s793_s16 = scalar_lea.sflag [#allocation5], %s792_s17 }
 0x38e   : > { %p1741_p12 = scmp.ge.s32.totalorder %s1740_s6, 2 }
 0x390   : > { %p1022_p7 = pnand %p1741_p12, %p1533_p6 }
 0x392   : > { %p1023_p9 = pneg %p1022_p7 }
 0x394   : > { %1360 = dma.done.wait (%p1023_p9), %s793_s16, 128  }
 0x395   : > { %1362 = vsyncadd (%p1023_p9), %s793_s16, 4294967168  ;;  %s803_s25 = scalar_lea.sflag [#allocation16], %s792_s17 }
 0x396   : > { %1364 = dma.done.wait (%p1023_p9), %s803_s25, 128  }
 0x397   : > { %1366 = vsyncadd (%p1023_p9), %s803_s25, 4294967168  ;;  %s1742_s12 = sld [smem:[#allocation26_spill]]  ;;  %s1745_s30 = smov %s1373_s10 }
 0x398   : > { %s1743_s23 = sld [smem:[#allocation24_spill]] }
 0x399   : > { %s1744_s11 = sld [smem:[#allocation27_spill]] }
 0x39d   : > { %p31_p4 = scmp.ge.s32.totalorder %s1742_s12, 4  }
 0x39e   : > { %s1746_s10 = smov %s1743_s23 }
 0x39f   :  { %33 = sbr.rel (!%p31_p4) target bundleno = 16 (0x10), region = 143 }
 0x3a4   :  { %809 = vsyncpa [#allocation4], 1 }
 0x3a5   :  { %811 = vsyncpa [#allocation4 + $0x1], 1 }
 0x3a6   :  { %812 = vsyncpa [#allocation7], 1 }
 0x3a7   :  { %814 = vsyncpa [#allocation7 + $0x1], 1 }
 0x3a8   :  { %815 = vsyncpa [#allocation10], 1 }
 0x3a9   :  { %816 = vsyncpa [#allocation13], 1 }
 0x3aa   :  { %817 = vsyncpa [#allocation5], 1 }
 0x3ab   :  { %819 = vsyncpa [#allocation5 + $0x1], 1 }
 0x3ac   :  { %820 = vsyncpa [#allocation16], 1 }
 0x3ad   :  { %822 = vsyncpa [#allocation16 + $0x1], 1 }

</bundles_post_ra>
